<compile_context>
chip_gen: v7x
topology: tpu7x:2x2x1
jax: 0.10.0
libtpu: 0.0.40
codegen_flags: <defaults>
</compile_context>

<pallas_src>
import functools

import jax
import jax.numpy as jnp
from jax.experimental import pallas as pl
from jax.experimental.pallas import tpu as pltpu


def _round_up(x, m):
    return (x + m - 1) // m * m


def _postnet_fused_kernel(x_ref, w_ref, b_ref, gamma_ref, beta_ref, o_ref,
                          act_ref, *, num_layers, K, pad, N, T, Cpad, eps,
                          matmul_dtype):
    """Fused PostNet forward (all layers in one kernel).

    x_ref:     (N, T, Cpad)            channel-padded input, channels-last
    w_ref:     (L, K*Cpad, Cpad)       stacked conv weights (im2col layout)
    b_ref:     (L, Cpad)               stacked conv biases
    gamma_ref: (L-1, Cpad)             BN scale for layers 0..L-2
    beta_ref:  (L-1, Cpad)             BN shift for layers 0..L-2
    o_ref:     (N, T, Cpad)            output (channel-padded)
    act_ref:   (N, T + 2*pad, Cpad)    VMEM scratch: activation + zero halo
    """
    # Zero the scratch once (the halo rows then stay zero for every layer),
    # then place the input in the interior.
    act_ref[...] = jnp.zeros_like(act_ref)
    act_ref[:, pad:pad + T, :] = x_ref[...].astype(jnp.float32)

    for layer in range(num_layers):          # static unrolled layer loop
        xp = act_ref[...]                    # (N, T + 2*pad, Cpad), f32
        # im2col: stack the K shifted views -> one MXU matmul per layer.
        cols = jnp.concatenate([xp[:, k:k + T, :] for k in range(K)], axis=-1)
        cols = cols.reshape(N * T, K * Cpad)            # (N*T, K*Cpad)
        w = w_ref[layer]                                # (K*Cpad, Cpad)
        y = jnp.dot(cols.astype(matmul_dtype), w.astype(matmul_dtype),
                    preferred_element_type=jnp.float32)  # (N*T, Cpad) f32
        y = y + b_ref[layer:layer + 1, :].astype(jnp.float32)

        if layer < num_layers - 1:
            # BatchNorm1d training-mode: per-channel batch stats over N*T.
            mean = jnp.mean(y, axis=0, keepdims=True)
            var = jnp.mean((y - mean) ** 2, axis=0, keepdims=True)
            y = (y - mean) * jax.lax.rsqrt(var + eps)
            y = (y * gamma_ref[layer:layer + 1, :].astype(jnp.float32)
                 + beta_ref[layer:layer + 1, :].astype(jnp.float32))
            y = jnp.tanh(y)
            # Single lane-dense store back into the scratch interior.
            act_ref[:, pad:pad + T, :] = y.reshape(N, T, Cpad)
        else:
            o_ref[...] = y.reshape(N, T, Cpad).astype(o_ref.dtype)


def _pack_params(params, Cpad):
    """Stack per-layer params into lane-dense (128-multiple) arrays."""
    L = len(params)
    K = params[0]["w"].shape[0]
    w_all = jnp.zeros((L, K, Cpad, Cpad), jnp.float32)
    b_all = jnp.zeros((L, Cpad), jnp.float32)
    n_bn = max(L - 1, 1)
    gamma_all = jnp.zeros((n_bn, Cpad), jnp.float32)
    beta_all = jnp.zeros((n_bn, Cpad), jnp.float32)
    for i, p in enumerate(params):
        _, cin, cout = p["w"].shape
        w_all = w_all.at[i, :, :cin, :cout].set(p["w"].astype(jnp.float32))
        b_all = b_all.at[i, :cout].set(p["b"].astype(jnp.float32))
        if i < L - 1:
            gamma_all = gamma_all.at[i, :cout].set(p["gamma"].astype(jnp.float32))
            beta_all = beta_all.at[i, :cout].set(p["beta"].astype(jnp.float32))
    # im2col weight layout: rows ordered k-major, cin-minor -> (L, K*Cpad, Cpad).
    w_all = w_all.reshape(L, K * Cpad, Cpad)
    return w_all, b_all, gamma_all, beta_all


def postnet_forward(params, x_ncw, *, padding, eps=1e-5,
                    matmul_dtype=jnp.float32):
    """x_ncw: (N, C_in, T) like PyTorch Conv1d input.  Returns (N, C_out, T)."""
    N, Cin, T = x_ncw.shape
    K = params[0]["w"].shape[0]
    Cout = params[-1]["w"].shape[2]
    L = len(params)
    if 2 * padding != K - 1:
        raise ValueError("fused kernel assumes same-length conv "
                         "(2*padding == kernel_size - 1)")

    # Shared lane-dense channel width for all layers.
    Cpad = _round_up(max([Cin] + [p["w"].shape[2] for p in params]), 128)
    w_all, b_all, gamma_all, beta_all = _pack_params(params, Cpad)

    # NCW -> NTC once, single channel zero-pad (no per-layer pads/transposes).
    x = jnp.transpose(x_ncw, (0, 2, 1)).astype(jnp.float32)
    x = jnp.pad(x, ((0, 0), (0, 0), (0, Cpad - Cin)))

    kernel = functools.partial(
        _postnet_fused_kernel, num_layers=L, K=K, pad=padding, N=N, T=T,
        Cpad=Cpad, eps=eps, matmul_dtype=matmul_dtype)

    vmem = lambda: pl.BlockSpec(memory_space=pltpu.MemorySpace.VMEM)
    out_pad = pl.pallas_call(
        kernel,
        out_shape=jax.ShapeDtypeStruct((N, T, Cpad), jnp.float32),
        in_specs=[vmem() for _ in range(5)],
        out_specs=vmem(),
        scratch_shapes=[pltpu.VMEM((N, T + 2 * padding, Cpad), jnp.float32)],
    )(x, w_all, b_all, gamma_all, beta_all)

    # Drop padded channels, NTC -> NCW.
    return jnp.transpose(out_pad[:, :, :Cout], (0, 2, 1))


def init_postnet_params(key, input_size, num_layers, hidden_size, output_size,
                        kernel_size):
    """Deterministic init mimicking PyTorch defaults (uniform conv, gamma=1, beta=0)."""
    sizes = ([(input_size, hidden_size)]
             + [(hidden_size, hidden_size)] * (num_layers - 2)
             + [(hidden_size, output_size)])
    params = []
    for cin, cout in sizes:
        key, wk, bk = jax.random.split(key, 3)
        bound = 1.0 / jnp.sqrt(cin * kernel_size)
        w = jax.random.uniform(wk, (kernel_size, cin, cout), jnp.float32,
                               -bound, bound)
        b = jax.random.uniform(bk, (cout,), jnp.float32, -bound, bound)
        params.append({
            "w": w,                      # (K, Cin, Cout)
            "b": b,
            "gamma": jnp.ones((cout,), jnp.float32),
            "beta": jnp.zeros((cout,), jnp.float32),
        })
    return params


def postnet_reference(params, x_ncw, *, padding, eps=1e-5):
    """Pure-JAX reference of the PyTorch forward (training-mode BatchNorm)."""
    x = x_ncw
    n_layers = len(params)
    for i, p in enumerate(params):
        w_oiw = jnp.transpose(p["w"], (2, 1, 0))  # (Cout, Cin, K)
        y = jax.lax.conv_general_dilated(
            x, w_oiw, window_strides=(1,), padding=[(padding, padding)],
            dimension_numbers=("NCH", "OIH", "NCH"))
        y = y + p["b"][None, :, None]
        if i != n_layers - 1:
            mean = jnp.mean(y, axis=(0, 2), keepdims=True)
            var = jnp.mean((y - mean) ** 2, axis=(0, 2), keepdims=True)
            y = (y - mean) / jnp.sqrt(var + eps)
            y = y * p["gamma"][None, :, None] + p["beta"][None, :, None]
            y = jnp.tanh(y)
        x = y
    return x


if __name__ == "__main__":
    # Small, forward-consistent shapes: (N, input_size, T)
    N, T = 2, 8
    input_size, hidden_size, output_size = 32, 64, 32
    num_layers, kernel_size, padding = 5, 5, 2

    key = jax.random.PRNGKey(0)
    pkey, xkey = jax.random.split(key)
    params = init_postnet_params(pkey, input_size, num_layers, hidden_size,
                                 output_size, kernel_size)
    x = jax.random.normal(xkey, (N, input_size, T), jnp.float32)

    out = postnet_forward(params, x, padding=padding)
    out = jax.block_until_ready(out)
    assert out.shape == (N, output_size, T), out.shape

    ref = postnet_reference(params, x, padding=padding)
    max_err = float(jnp.max(jnp.abs(out - ref)))
    if max_err > 1e-3:
        raise AssertionError(f"Pallas PostNet mismatch vs reference: {max_err}")

    print("KERNEL_OK")
</pallas_src>

<mosaic_0001>
module attributes {stable_mosaic.version = 11 : i64} {
  func.func @_postnet_fused_kernel(%arg0: memref<2x8x128xf32, #tpu.memory_space<vmem>>, %arg1: memref<5x640x128xf32, #tpu.memory_space<vmem>>, %arg2: memref<5x128xf32, #tpu.memory_space<vmem>>, %arg3: memref<4x128xf32, #tpu.memory_space<vmem>>, %arg4: memref<4x128xf32, #tpu.memory_space<vmem>>, %arg5: memref<2x8x128xf32, #tpu.memory_space<vmem>>, %arg6: memref<2x12x128xf32, #tpu.memory_space<vmem>>) attributes {dimension_semantics = [], scalar_prefetch = 0 : i64, scratch_operands = 1 : i64, tpu.core_type = #tpu.core_type<tc>} {
    %cst = arith.constant 0.000000e+00 : f32
    %0 = vector.broadcast %cst : f32 to vector<2x12x128xf32>
    %c0 = arith.constant 0 : index
    %c0_0 = arith.constant 0 : index
    %c0_1 = arith.constant 0 : index
    %1 = vector.load %arg6[%c0, %c0_0, %c0_1] : memref<2x12x128xf32, #tpu.memory_space<vmem>>, vector<2x12x128xf32>
    tpu.vector_store %arg6[%c0, %c0_0, %c0_1], %0 {strides = array<i32>} : memref<2x12x128xf32, #tpu.memory_space<vmem>>, vector<2x12x128xf32>,
    %c0_2 = arith.constant 0 : index
    %c0_3 = arith.constant 0 : index
    %c0_4 = arith.constant 0 : index
    %2 = vector.load %arg0[%c0_2, %c0_3, %c0_4] : memref<2x8x128xf32, #tpu.memory_space<vmem>>, vector<2x8x128xf32>
    %c0_5 = arith.constant 0 : index
    %c2 = arith.constant 2 : index
    %c0_6 = arith.constant 0 : index
    %3 = vector.load %arg6[%c0_5, %c2, %c0_6] : memref<2x12x128xf32, #tpu.memory_space<vmem>>, vector<2x8x128xf32>
    tpu.vector_store %arg6[%c0_5, %c2, %c0_6], %2 {strides = array<i32>} : memref<2x12x128xf32, #tpu.memory_space<vmem>>, vector<2x8x128xf32>,
    %c0_7 = arith.constant 0 : index
    %c0_8 = arith.constant 0 : index
    %c0_9 = arith.constant 0 : index
    %4 = vector.load %arg6[%c0_7, %c0_8, %c0_9] : memref<2x12x128xf32, #tpu.memory_space<vmem>>, vector<2x12x128xf32>
    %5 = vector.extract_strided_slice %4 {offsets = [0, 0, 0], sizes = [2, 8, 128], strides = [1, 1, 1]} : vector<2x12x128xf32> to vector<2x8x128xf32>
    %6 = vector.extract_strided_slice %4 {offsets = [0, 1, 0], sizes = [2, 8, 128], strides = [1, 1, 1]} : vector<2x12x128xf32> to vector<2x8x128xf32>
    %7 = vector.extract_strided_slice %4 {offsets = [0, 2, 0], sizes = [2, 8, 128], strides = [1, 1, 1]} : vector<2x12x128xf32> to vector<2x8x128xf32>
    %8 = vector.extract_strided_slice %4 {offsets = [0, 3, 0], sizes = [2, 8, 128], strides = [1, 1, 1]} : vector<2x12x128xf32> to vector<2x8x128xf32>
    %9 = vector.extract_strided_slice %4 {offsets = [0, 4, 0], sizes = [2, 8, 128], strides = [1, 1, 1]} : vector<2x12x128xf32> to vector<2x8x128xf32>
    %10 = tpu.concatenate %5, %6, %7, %8, %9 in 2 : vector<2x8x128xf32>, vector<2x8x128xf32>, vector<2x8x128xf32>, vector<2x8x128xf32>, vector<2x8x128xf32> -> vector<2x8x640xf32>
    %11 = vector.shape_cast %10 : vector<2x8x640xf32> to vector<16x640xf32>
    %c0_10 = arith.constant 0 : index
    %c0_11 = arith.constant 0 : index
    %c0_12 = arith.constant 0 : index
    %12 = vector.load %arg1[%c0_10, %c0_11, %c0_12] : memref<5x640x128xf32, #tpu.memory_space<vmem>>, vector<1x640x128xf32>
    %13 = vector.shape_cast %12 : vector<1x640x128xf32> to vector<640x128xf32>
    %cst_13 = arith.constant dense<0.000000e+00> : vector<16x128xf32>
    %14 = tpu.matmul %11, %13, %cst_13 {dimension_numbers = #tpu.dot_dimension_numbers<[1], [0], [0], [1], [0, 0, 1, 1], [], []>} : vector<16x640xf32>, vector<640x128xf32>, vector<16x128xf32> -> vector<16x128xf32>
    %c0_14 = arith.constant 0 : index
    %c0_15 = arith.constant 0 : index
    %15 = vector.load %arg2[%c0_14, %c0_15] : memref<5x128xf32, #tpu.memory_space<vmem>>, vector<1x128xf32>
    %16 = vector.broadcast %15 : vector<1x128xf32> to vector<16x128xf32>
    %17 = arith.addf %14, %16 : vector<16x128xf32>
    %cst_16 = arith.constant dense<0.000000e+00> : vector<128xf32>
    %18 = vector.multi_reduction <add>, %17, %cst_16 [0] : vector<16x128xf32> to vector<128xf32>
    %19 = vector.shape_cast %18 : vector<128xf32> to vector<1x128xf32>
    %cst_17 = arith.constant 1.600000e+01 : f32
    %20 = vector.broadcast %cst_17 : f32 to vector<1x128xf32>
    %21 = arith.divf %19, %20 : vector<1x128xf32>
    %22 = vector.broadcast %21 : vector<1x128xf32> to vector<16x128xf32>
    %23 = arith.subf %17, %22 : vector<16x128xf32>
    %24 = arith.mulf %23, %23 : vector<16x128xf32>
    %cst_18 = arith.constant dense<0.000000e+00> : vector<128xf32>
    %25 = vector.multi_reduction <add>, %24, %cst_18 [0] : vector<16x128xf32> to vector<128xf32>
    %26 = vector.shape_cast %25 : vector<128xf32> to vector<1x128xf32>
    %cst_19 = arith.constant 1.600000e+01 : f32
    %27 = vector.broadcast %cst_19 : f32 to vector<1x128xf32>
    %28 = arith.divf %26, %27 : vector<1x128xf32>
    %29 = vector.broadcast %21 : vector<1x128xf32> to vector<16x128xf32>
    %30 = arith.subf %17, %29 : vector<16x128xf32>
    %cst_20 = arith.constant 9.99999974E-6 : f32
    %31 = vector.broadcast %cst_20 : f32 to vector<1x128xf32>
    %32 = arith.addf %28, %31 : vector<1x128xf32>
    %33 = math.rsqrt %32 : vector<1x128xf32>
    %34 = vector.broadcast %33 : vector<1x128xf32> to vector<16x128xf32>
    %35 = arith.mulf %30, %34 : vector<16x128xf32>
    %c0_21 = arith.constant 0 : index
    %c0_22 = arith.constant 0 : index
    %36 = vector.load %arg3[%c0_21, %c0_22] : memref<4x128xf32, #tpu.memory_space<vmem>>, vector<1x128xf32>
    %37 = vector.broadcast %36 : vector<1x128xf32> to vector<16x128xf32>
    %38 = arith.mulf %35, %37 : vector<16x128xf32>
    %c0_23 = arith.constant 0 : index
    %c0_24 = arith.constant 0 : index
    %39 = vector.load %arg4[%c0_23, %c0_24] : memref<4x128xf32, #tpu.memory_space<vmem>>, vector<1x128xf32>
    %40 = vector.broadcast %39 : vector<1x128xf32> to vector<16x128xf32>
    %41 = arith.addf %38, %40 : vector<16x128xf32>
    %42 = math.tanh %41 : vector<16x128xf32>
    %43 = vector.shape_cast %42 : vector<16x128xf32> to vector<2x8x128xf32>
    %c0_25 = arith.constant 0 : index
    %c2_26 = arith.constant 2 : index
    %c0_27 = arith.constant 0 : index
    %44 = vector.load %arg6[%c0_25, %c2_26, %c0_27] : memref<2x12x128xf32, #tpu.memory_space<vmem>>, vector<2x8x128xf32>
    tpu.vector_store %arg6[%c0_25, %c2_26, %c0_27], %43 {strides = array<i32>} : memref<2x12x128xf32, #tpu.memory_space<vmem>>, vector<2x8x128xf32>,
    %c0_28 = arith.constant 0 : index
    %c0_29 = arith.constant 0 : index
    %c0_30 = arith.constant 0 : index
    %45 = vector.load %arg6[%c0_28, %c0_29, %c0_30] : memref<2x12x128xf32, #tpu.memory_space<vmem>>, vector<2x12x128xf32>
    %46 = vector.extract_strided_slice %45 {offsets = [0, 0, 0], sizes = [2, 8, 128], strides = [1, 1, 1]} : vector<2x12x128xf32> to vector<2x8x128xf32>
    %47 = vector.extract_strided_slice %45 {offsets = [0, 1, 0], sizes = [2, 8, 128], strides = [1, 1, 1]} : vector<2x12x128xf32> to vector<2x8x128xf32>
    %48 = vector.extract_strided_slice %45 {offsets = [0, 2, 0], sizes = [2, 8, 128], strides = [1, 1, 1]} : vector<2x12x128xf32> to vector<2x8x128xf32>
    %49 = vector.extract_strided_slice %45 {offsets = [0, 3, 0], sizes = [2, 8, 128], strides = [1, 1, 1]} : vector<2x12x128xf32> to vector<2x8x128xf32>
    %50 = vector.extract_strided_slice %45 {offsets = [0, 4, 0], sizes = [2, 8, 128], strides = [1, 1, 1]} : vector<2x12x128xf32> to vector<2x8x128xf32>
    %51 = tpu.concatenate %46, %47, %48, %49, %50 in 2 : vector<2x8x128xf32>, vector<2x8x128xf32>, vector<2x8x128xf32>, vector<2x8x128xf32>, vector<2x8x128xf32> -> vector<2x8x640xf32>
    %52 = vector.shape_cast %51 : vector<2x8x640xf32> to vector<16x640xf32>
    %c1 = arith.constant 1 : index
    %c0_31 = arith.constant 0 : index
    %c0_32 = arith.constant 0 : index
    %53 = vector.load %arg1[%c1, %c0_31, %c0_32] : memref<5x640x128xf32, #tpu.memory_space<vmem>>, vector<1x640x128xf32>
    %54 = vector.shape_cast %53 : vector<1x640x128xf32> to vector<640x128xf32>
    %cst_33 = arith.constant dense<0.000000e+00> : vector<16x128xf32>
    %55 = tpu.matmul %52, %54, %cst_33 {dimension_numbers = #tpu.dot_dimension_numbers<[1], [0], [0], [1], [0, 0, 1, 1], [], []>} : vector<16x640xf32>, vector<640x128xf32>, vector<16x128xf32> -> vector<16x128xf32>
    %c1_34 = arith.constant 1 : index
    %c0_35 = arith.constant 0 : index
    %56 = vector.load %arg2[%c1_34, %c0_35] : memref<5x128xf32, #tpu.memory_space<vmem>>, vector<1x128xf32>
    %57 = vector.broadcast %56 : vector<1x128xf32> to vector<16x128xf32>
    %58 = arith.addf %55, %57 : vector<16x128xf32>
    %cst_36 = arith.constant dense<0.000000e+00> : vector<128xf32>
    %59 = vector.multi_reduction <add>, %58, %cst_36 [0] : vector<16x128xf32> to vector<128xf32>
    %60 = vector.shape_cast %59 : vector<128xf32> to vector<1x128xf32>
    %cst_37 = arith.constant 1.600000e+01 : f32
    %61 = vector.broadcast %cst_37 : f32 to vector<1x128xf32>
    %62 = arith.divf %60, %61 : vector<1x128xf32>
    %63 = vector.broadcast %62 : vector<1x128xf32> to vector<16x128xf32>
    %64 = arith.subf %58, %63 : vector<16x128xf32>
    %65 = arith.mulf %64, %64 : vector<16x128xf32>
    %cst_38 = arith.constant dense<0.000000e+00> : vector<128xf32>
    %66 = vector.multi_reduction <add>, %65, %cst_38 [0] : vector<16x128xf32> to vector<128xf32>
    %67 = vector.shape_cast %66 : vector<128xf32> to vector<1x128xf32>
    %cst_39 = arith.constant 1.600000e+01 : f32
    %68 = vector.broadcast %cst_39 : f32 to vector<1x128xf32>
    %69 = arith.divf %67, %68 : vector<1x128xf32>
    %70 = vector.broadcast %62 : vector<1x128xf32> to vector<16x128xf32>
    %71 = arith.subf %58, %70 : vector<16x128xf32>
    %cst_40 = arith.constant 9.99999974E-6 : f32
    %72 = vector.broadcast %cst_40 : f32 to vector<1x128xf32>
    %73 = arith.addf %69, %72 : vector<1x128xf32>
    %74 = math.rsqrt %73 : vector<1x128xf32>
    %75 = vector.broadcast %74 : vector<1x128xf32> to vector<16x128xf32>
    %76 = arith.mulf %71, %75 : vector<16x128xf32>
    %c1_41 = arith.constant 1 : index
    %c0_42 = arith.constant 0 : index
    %77 = vector.load %arg3[%c1_41, %c0_42] : memref<4x128xf32, #tpu.memory_space<vmem>>, vector<1x128xf32>
    %78 = vector.broadcast %77 : vector<1x128xf32> to vector<16x128xf32>
    %79 = arith.mulf %76, %78 : vector<16x128xf32>
    %c1_43 = arith.constant 1 : index
    %c0_44 = arith.constant 0 : index
    %80 = vector.load %arg4[%c1_43, %c0_44] : memref<4x128xf32, #tpu.memory_space<vmem>>, vector<1x128xf32>
    %81 = vector.broadcast %80 : vector<1x128xf32> to vector<16x128xf32>
    %82 = arith.addf %79, %81 : vector<16x128xf32>
    %83 = math.tanh %82 : vector<16x128xf32>
    %84 = vector.shape_cast %83 : vector<16x128xf32> to vector<2x8x128xf32>
    %c0_45 = arith.constant 0 : index
    %c2_46 = arith.constant 2 : index
    %c0_47 = arith.constant 0 : index
    %85 = vector.load %arg6[%c0_45, %c2_46, %c0_47] : memref<2x12x128xf32, #tpu.memory_space<vmem>>, vector<2x8x128xf32>
    tpu.vector_store %arg6[%c0_45, %c2_46, %c0_47], %84 {strides = array<i32>} : memref<2x12x128xf32, #tpu.memory_space<vmem>>, vector<2x8x128xf32>,
    %c0_48 = arith.constant 0 : index
    %c0_49 = arith.constant 0 : index
    %c0_50 = arith.constant 0 : index
    %86 = vector.load %arg6[%c0_48, %c0_49, %c0_50] : memref<2x12x128xf32, #tpu.memory_space<vmem>>, vector<2x12x128xf32>
    %87 = vector.extract_strided_slice %86 {offsets = [0, 0, 0], sizes = [2, 8, 128], strides = [1, 1, 1]} : vector<2x12x128xf32> to vector<2x8x128xf32>
    %88 = vector.extract_strided_slice %86 {offsets = [0, 1, 0], sizes = [2, 8, 128], strides = [1, 1, 1]} : vector<2x12x128xf32> to vector<2x8x128xf32>
    %89 = vector.extract_strided_slice %86 {offsets = [0, 2, 0], sizes = [2, 8, 128], strides = [1, 1, 1]} : vector<2x12x128xf32> to vector<2x8x128xf32>
    %90 = vector.extract_strided_slice %86 {offsets = [0, 3, 0], sizes = [2, 8, 128], strides = [1, 1, 1]} : vector<2x12x128xf32> to vector<2x8x128xf32>
    %91 = vector.extract_strided_slice %86 {offsets = [0, 4, 0], sizes = [2, 8, 128], strides = [1, 1, 1]} : vector<2x12x128xf32> to vector<2x8x128xf32>
    %92 = tpu.concatenate %87, %88, %89, %90, %91 in 2 : vector<2x8x128xf32>, vector<2x8x128xf32>, vector<2x8x128xf32>, vector<2x8x128xf32>, vector<2x8x128xf32> -> vector<2x8x640xf32>
    %93 = vector.shape_cast %92 : vector<2x8x640xf32> to vector<16x640xf32>
    %c2_51 = arith.constant 2 : index
    %c0_52 = arith.constant 0 : index
    %c0_53 = arith.constant 0 : index
    %94 = vector.load %arg1[%c2_51, %c0_52, %c0_53] : memref<5x640x128xf32, #tpu.memory_space<vmem>>, vector<1x640x128xf32>
    %95 = vector.shape_cast %94 : vector<1x640x128xf32> to vector<640x128xf32>
    %cst_54 = arith.constant dense<0.000000e+00> : vector<16x128xf32>
    %96 = tpu.matmul %93, %95, %cst_54 {dimension_numbers = #tpu.dot_dimension_numbers<[1], [0], [0], [1], [0, 0, 1, 1], [], []>} : vector<16x640xf32>, vector<640x128xf32>, vector<16x128xf32> -> vector<16x128xf32>
    %c2_55 = arith.constant 2 : index
    %c0_56 = arith.constant 0 : index
    %97 = vector.load %arg2[%c2_55, %c0_56] : memref<5x128xf32, #tpu.memory_space<vmem>>, vector<1x128xf32>
    %98 = vector.broadcast %97 : vector<1x128xf32> to vector<16x128xf32>
    %99 = arith.addf %96, %98 : vector<16x128xf32>
    %cst_57 = arith.constant dense<0.000000e+00> : vector<128xf32>
    %100 = vector.multi_reduction <add>, %99, %cst_57 [0] : vector<16x128xf32> to vector<128xf32>
    %101 = vector.shape_cast %100 : vector<128xf32> to vector<1x128xf32>
    %cst_58 = arith.constant 1.600000e+01 : f32
    %102 = vector.broadcast %cst_58 : f32 to vector<1x128xf32>
    %103 = arith.divf %101, %102 : vector<1x128xf32>
    %104 = vector.broadcast %103 : vector<1x128xf32> to vector<16x128xf32>
    %105 = arith.subf %99, %104 : vector<16x128xf32>
    %106 = arith.mulf %105, %105 : vector<16x128xf32>
    %cst_59 = arith.constant dense<0.000000e+00> : vector<128xf32>
    %107 = vector.multi_reduction <add>, %106, %cst_59 [0] : vector<16x128xf32> to vector<128xf32>
    %108 = vector.shape_cast %107 : vector<128xf32> to vector<1x128xf32>
    %cst_60 = arith.constant 1.600000e+01 : f32
    %109 = vector.broadcast %cst_60 : f32 to vector<1x128xf32>
    %110 = arith.divf %108, %109 : vector<1x128xf32>
    %111 = vector.broadcast %103 : vector<1x128xf32> to vector<16x128xf32>
    %112 = arith.subf %99, %111 : vector<16x128xf32>
    %cst_61 = arith.constant 9.99999974E-6 : f32
    %113 = vector.broadcast %cst_61 : f32 to vector<1x128xf32>
    %114 = arith.addf %110, %113 : vector<1x128xf32>
    %115 = math.rsqrt %114 : vector<1x128xf32>
    %116 = vector.broadcast %115 : vector<1x128xf32> to vector<16x128xf32>
    %117 = arith.mulf %112, %116 : vector<16x128xf32>
    %c2_62 = arith.constant 2 : index
    %c0_63 = arith.constant 0 : index
    %118 = vector.load %arg3[%c2_62, %c0_63] : memref<4x128xf32, #tpu.memory_space<vmem>>, vector<1x128xf32>
    %119 = vector.broadcast %118 : vector<1x128xf32> to vector<16x128xf32>
    %120 = arith.mulf %117, %119 : vector<16x128xf32>
    %c2_64 = arith.constant 2 : index
    %c0_65 = arith.constant 0 : index
    %121 = vector.load %arg4[%c2_64, %c0_65] : memref<4x128xf32, #tpu.memory_space<vmem>>, vector<1x128xf32>
    %122 = vector.broadcast %121 : vector<1x128xf32> to vector<16x128xf32>
    %123 = arith.addf %120, %122 : vector<16x128xf32>
    %124 = math.tanh %123 : vector<16x128xf32>
    %125 = vector.shape_cast %124 : vector<16x128xf32> to vector<2x8x128xf32>
    %c0_66 = arith.constant 0 : index
    %c2_67 = arith.constant 2 : index
    %c0_68 = arith.constant 0 : index
    %126 = vector.load %arg6[%c0_66, %c2_67, %c0_68] : memref<2x12x128xf32, #tpu.memory_space<vmem>>, vector<2x8x128xf32>
    tpu.vector_store %arg6[%c0_66, %c2_67, %c0_68], %125 {strides = array<i32>} : memref<2x12x128xf32, #tpu.memory_space<vmem>>, vector<2x8x128xf32>,
    %c0_69 = arith.constant 0 : index
    %c0_70 = arith.constant 0 : index
    %c0_71 = arith.constant 0 : index
    %127 = vector.load %arg6[%c0_69, %c0_70, %c0_71] : memref<2x12x128xf32, #tpu.memory_space<vmem>>, vector<2x12x128xf32>
    %128 = vector.extract_strided_slice %127 {offsets = [0, 0, 0], sizes = [2, 8, 128], strides = [1, 1, 1]} : vector<2x12x128xf32> to vector<2x8x128xf32>
    %129 = vector.extract_strided_slice %127 {offsets = [0, 1, 0], sizes = [2, 8, 128], strides = [1, 1, 1]} : vector<2x12x128xf32> to vector<2x8x128xf32>
    %130 = vector.extract_strided_slice %127 {offsets = [0, 2, 0], sizes = [2, 8, 128], strides = [1, 1, 1]} : vector<2x12x128xf32> to vector<2x8x128xf32>
    %131 = vector.extract_strided_slice %127 {offsets = [0, 3, 0], sizes = [2, 8, 128], strides = [1, 1, 1]} : vector<2x12x128xf32> to vector<2x8x128xf32>
    %132 = vector.extract_strided_slice %127 {offsets = [0, 4, 0], sizes = [2, 8, 128], strides = [1, 1, 1]} : vector<2x12x128xf32> to vector<2x8x128xf32>
    %133 = tpu.concatenate %128, %129, %130, %131, %132 in 2 : vector<2x8x128xf32>, vector<2x8x128xf32>, vector<2x8x128xf32>, vector<2x8x128xf32>, vector<2x8x128xf32> -> vector<2x8x640xf32>
    %134 = vector.shape_cast %133 : vector<2x8x640xf32> to vector<16x640xf32>
    %c3 = arith.constant 3 : index
    %c0_72 = arith.constant 0 : index
    %c0_73 = arith.constant 0 : index
    %135 = vector.load %arg1[%c3, %c0_72, %c0_73] : memref<5x640x128xf32, #tpu.memory_space<vmem>>, vector<1x640x128xf32>
    %136 = vector.shape_cast %135 : vector<1x640x128xf32> to vector<640x128xf32>
    %cst_74 = arith.constant dense<0.000000e+00> : vector<16x128xf32>
    %137 = tpu.matmul %134, %136, %cst_74 {dimension_numbers = #tpu.dot_dimension_numbers<[1], [0], [0], [1], [0, 0, 1, 1], [], []>} : vector<16x640xf32>, vector<640x128xf32>, vector<16x128xf32> -> vector<16x128xf32>
    %c3_75 = arith.constant 3 : index
    %c0_76 = arith.constant 0 : index
    %138 = vector.load %arg2[%c3_75, %c0_76] : memref<5x128xf32, #tpu.memory_space<vmem>>, vector<1x128xf32>
    %139 = vector.broadcast %138 : vector<1x128xf32> to vector<16x128xf32>
    %140 = arith.addf %137, %139 : vector<16x128xf32>
    %cst_77 = arith.constant dense<0.000000e+00> : vector<128xf32>
    %141 = vector.multi_reduction <add>, %140, %cst_77 [0] : vector<16x128xf32> to vector<128xf32>
    %142 = vector.shape_cast %141 : vector<128xf32> to vector<1x128xf32>
    %cst_78 = arith.constant 1.600000e+01 : f32
    %143 = vector.broadcast %cst_78 : f32 to vector<1x128xf32>
    %144 = arith.divf %142, %143 : vector<1x128xf32>
    %145 = vector.broadcast %144 : vector<1x128xf32> to vector<16x128xf32>
    %146 = arith.subf %140, %145 : vector<16x128xf32>
    %147 = arith.mulf %146, %146 : vector<16x128xf32>
    %cst_79 = arith.constant dense<0.000000e+00> : vector<128xf32>
    %148 = vector.multi_reduction <add>, %147, %cst_79 [0] : vector<16x128xf32> to vector<128xf32>
    %149 = vector.shape_cast %148 : vector<128xf32> to vector<1x128xf32>
    %cst_80 = arith.constant 1.600000e+01 : f32
    %150 = vector.broadcast %cst_80 : f32 to vector<1x128xf32>
    %151 = arith.divf %149, %150 : vector<1x128xf32>
    %152 = vector.broadcast %144 : vector<1x128xf32> to vector<16x128xf32>
    %153 = arith.subf %140, %152 : vector<16x128xf32>
    %cst_81 = arith.constant 9.99999974E-6 : f32
    %154 = vector.broadcast %cst_81 : f32 to vector<1x128xf32>
    %155 = arith.addf %151, %154 : vector<1x128xf32>
    %156 = math.rsqrt %155 : vector<1x128xf32>
    %157 = vector.broadcast %156 : vector<1x128xf32> to vector<16x128xf32>
    %158 = arith.mulf %153, %157 : vector<16x128xf32>
    %c3_82 = arith.constant 3 : index
    %c0_83 = arith.constant 0 : index
    %159 = vector.load %arg3[%c3_82, %c0_83] : memref<4x128xf32, #tpu.memory_space<vmem>>, vector<1x128xf32>
    %160 = vector.broadcast %159 : vector<1x128xf32> to vector<16x128xf32>
    %161 = arith.mulf %158, %160 : vector<16x128xf32>
    %c3_84 = arith.constant 3 : index
    %c0_85 = arith.constant 0 : index
    %162 = vector.load %arg4[%c3_84, %c0_85] : memref<4x128xf32, #tpu.memory_space<vmem>>, vector<1x128xf32>
    %163 = vector.broadcast %162 : vector<1x128xf32> to vector<16x128xf32>
    %164 = arith.addf %161, %163 : vector<16x128xf32>
    %165 = math.tanh %164 : vector<16x128xf32>
    %166 = vector.shape_cast %165 : vector<16x128xf32> to vector<2x8x128xf32>
    %c0_86 = arith.constant 0 : index
    %c2_87 = arith.constant 2 : index
    %c0_88 = arith.constant 0 : index
    %167 = vector.load %arg6[%c0_86, %c2_87, %c0_88] : memref<2x12x128xf32, #tpu.memory_space<vmem>>, vector<2x8x128xf32>
    tpu.vector_store %arg6[%c0_86, %c2_87, %c0_88], %166 {strides = array<i32>} : memref<2x12x128xf32, #tpu.memory_space<vmem>>, vector<2x8x128xf32>,
    %c0_89 = arith.constant 0 : index
    %c0_90 = arith.constant 0 : index
    %c0_91 = arith.constant 0 : index
    %168 = vector.load %arg6[%c0_89, %c0_90, %c0_91] : memref<2x12x128xf32, #tpu.memory_space<vmem>>, vector<2x12x128xf32>
    %169 = vector.extract_strided_slice %168 {offsets = [0, 0, 0], sizes = [2, 8, 128], strides = [1, 1, 1]} : vector<2x12x128xf32> to vector<2x8x128xf32>
    %170 = vector.extract_strided_slice %168 {offsets = [0, 1, 0], sizes = [2, 8, 128], strides = [1, 1, 1]} : vector<2x12x128xf32> to vector<2x8x128xf32>
    %171 = vector.extract_strided_slice %168 {offsets = [0, 2, 0], sizes = [2, 8, 128], strides = [1, 1, 1]} : vector<2x12x128xf32> to vector<2x8x128xf32>
    %172 = vector.extract_strided_slice %168 {offsets = [0, 3, 0], sizes = [2, 8, 128], strides = [1, 1, 1]} : vector<2x12x128xf32> to vector<2x8x128xf32>
    %173 = vector.extract_strided_slice %168 {offsets = [0, 4, 0], sizes = [2, 8, 128], strides = [1, 1, 1]} : vector<2x12x128xf32> to vector<2x8x128xf32>
    %174 = tpu.concatenate %169, %170, %171, %172, %173 in 2 : vector<2x8x128xf32>, vector<2x8x128xf32>, vector<2x8x128xf32>, vector<2x8x128xf32>, vector<2x8x128xf32> -> vector<2x8x640xf32>
    %175 = vector.shape_cast %174 : vector<2x8x640xf32> to vector<16x640xf32>
    %c4 = arith.constant 4 : index
    %c0_92 = arith.constant 0 : index
    %c0_93 = arith.constant 0 : index
    %176 = vector.load %arg1[%c4, %c0_92, %c0_93] : memref<5x640x128xf32, #tpu.memory_space<vmem>>, vector<1x640x128xf32>
    %177 = vector.shape_cast %176 : vector<1x640x128xf32> to vector<640x128xf32>
    %cst_94 = arith.constant dense<0.000000e+00> : vector<16x128xf32>
    %178 = tpu.matmul %175, %177, %cst_94 {dimension_numbers = #tpu.dot_dimension_numbers<[1], [0], [0], [1], [0, 0, 1, 1], [], []>} : vector<16x640xf32>, vector<640x128xf32>, vector<16x128xf32> -> vector<16x128xf32>
    %c4_95 = arith.constant 4 : index
    %c0_96 = arith.constant 0 : index
    %179 = vector.load %arg2[%c4_95, %c0_96] : memref<5x128xf32, #tpu.memory_space<vmem>>, vector<1x128xf32>
    %180 = vector.broadcast %179 : vector<1x128xf32> to vector<16x128xf32>
    %181 = arith.addf %178, %180 : vector<16x128xf32>
    %182 = vector.shape_cast %181 : vector<16x128xf32> to vector<2x8x128xf32>
    %c0_97 = arith.constant 0 : index
    %c0_98 = arith.constant 0 : index
    %c0_99 = arith.constant 0 : index
    %183 = vector.load %arg5[%c0_97, %c0_98, %c0_99] : memref<2x8x128xf32, #tpu.memory_space<vmem>>, vector<2x8x128xf32>
    tpu.vector_store %arg5[%c0_97, %c0_98, %c0_99], %182 {strides = array<i32>} : memref<2x8x128xf32, #tpu.memory_space<vmem>>, vector<2x8x128xf32>,
    return
  }
}

</mosaic_0001>

<bundles_post_ra>
// kernel: tpu_custom_call.1
= control target key start
LH: loop header
LB: loop body
LE: loop exit
PB: predicated region body
PF: predicated region fallthrough
CT: control target
= control target key end

     0   :  { %10 = vsyncpa [#allocation4], 0  ;;  %s3554_s0 = inlined_call_operand.hbm [shape: f32[2,8,128], index: 0, kind: input, shape index: {}]   ;;  %s3555_s1 = inlined_call_operand.hbm [shape: f32[5,640,128], index: 1, kind: input, shape index: {}]   ;;  %s3556_s2 = inlined_call_operand.hbm [shape: f32[5,128], index: 2, kind: input, shape index: {}]   ;;  %s3557_s3 = inlined_call_operand.hbm [shape: f32[4,128], index: 3, kind: input, shape index: {}]   ;;  %s3558_s4 = inlined_call_operand.hbm [shape: f32[4,128], index: 4, kind: input, shape index: {}]   ;;  %s3559_s5 = inlined_call_operand.hbm [shape: f32[2,8,128], index: 5, kind: output, shape index: {}]  }
   0x1   :  { %11 = vsyncpa [#allocation7], 0 }
   0x2   :  { %12 = vsyncpa [#allocation10], 0 }
   0x3   :  { %13 = vsyncpa [#allocation5], 0  ;;  %s3350_s18 = smov [#allocation6]   ;;  %s3351_s20 = smov [#allocation9]  }
   0x4   :  { %s31_s19 = sshll.u32 %s3350_s18, 4  ;;  %s54_s21 = sshll.u32 %s3351_s20, 4  ;;  %s32_s19 = int_to_ptr.vmem [resolvable:$true] %s31_s19  ;;  %s55_s21 = int_to_ptr.vmem [resolvable:$true] %s54_s21 }
   0x5   :  { %s3210_s24 = scalar_lea.hbm %s3555_s1, 51200 }
   0x6   :  { %p3211_p0 = scmp.ne.s32.totalorder %s3555_s1, %s3210_s24  ;;  %p3214_p1 = scmp.lt.u32.totalorder %s3210_s24, %s3555_s1 }
   0x8   :  { %p3216_p2 = pnand %p3214_p1, %p3211_p0 }
   0xa   :  { %3219 = shalt.err (!%p3216_p2)
}
   0xb   :  { %s3220_s29 = scalar_lea.vmem %s32_s19, 51200  ;;  %p3225_p4 = scmp.lt.s32.totalorder %s32_s19, %s32_s19 }
   0xc   :  { %p3221_p3 = scmp.ne.s32.totalorder %s32_s19, %s3220_s29  ;;  %p3226_p5 = scmp.lt.s32.totalorder %s3220_s29, %s3220_s29 }
   0xe   :  { %p3227_p6 = por %p3226_p5, %p3225_p4 }
  0x10   :  { %p3228_p7 = pnand %p3227_p6, %p3221_p3 }
  0x12   :  { %3231 = shalt.err (!%p3228_p7)
}
  0x13   :  { %s3352_s30 = smov 128   ;;  %s3353_s6 = smov 8  }
  0x14   :  { %37 = dma.hbm_to_vmem [thread:$0]  %s3555_s1, 51200, %s32_s19, [#allocation7], %s3352_s30, %s3352_s30, %s3353_s6  }
  0x15   :  { %s3232_s11 = scalar_lea.hbm %s3557_s3, 64 }
  0x16   :  { %p3233_p8 = scmp.ne.s32.totalorder %s3557_s3, %s3232_s11  ;;  %p3236_p9 = scmp.lt.u32.totalorder %s3232_s11, %s3557_s3 }
  0x18   :  { %p3238_p10 = pnand %p3236_p9, %p3233_p8 }
  0x1a   :  { %3241 = shalt.err (!%p3238_p10)
}
  0x1b   :  { %s3242_s16 = scalar_lea.vmem %s55_s21, 64  ;;  %p3247_p12 = scmp.lt.s32.totalorder %s55_s21, %s55_s21 }
  0x1c   :  { %p3243_p11 = scmp.ne.s32.totalorder %s55_s21, %s3242_s16  ;;  %p3248_p13 = scmp.lt.s32.totalorder %s3242_s16, %s3242_s16 }
  0x1e   :  { %p3249_p0 = por %p3248_p13, %p3247_p12 }
  0x20   :  { %p3250_p1 = pnand %p3249_p0, %p3243_p11 }
  0x22   :  { %3253 = shalt.err (!%p3250_p1)
}
  0x23   :  { %57 = dma.hbm_to_vmem [thread:$0]  %s3557_s3, 64, %s55_s21, [#allocation10]  }
  0x24   :  { %s3354_s18 = smov [#allocation3]   ;;  %s3355_s20 = smov [#allocation8]  }
  0x25   :  { %s19_s19 = sshll.u32 %s3354_s18, 4  ;;  %s44_s22 = sshll.u32 %s3355_s20, 4  ;;  %s20_s19 = int_to_ptr.vmem [resolvable:$true] %s19_s19  ;;  %s45_s22 = int_to_ptr.vmem [resolvable:$true] %s44_s22 }
  0x26   :  { %s3254_s25 = scalar_lea.hbm %s3554_s0, 256 }
  0x27   :  { %p3255_p2 = scmp.ne.s32.totalorder %s3554_s0, %s3254_s25  ;;  %p3258_p3 = scmp.lt.u32.totalorder %s3254_s25, %s3554_s0 }
  0x29   :  { %p3260_p4 = pnand %p3258_p3, %p3255_p2 }
  0x2b   :  { %3263 = shalt.err (!%p3260_p4)
}
  0x2c   :  { %s3264_s3 = scalar_lea.vmem %s20_s19, 256  ;;  %p3269_p6 = scmp.lt.s32.totalorder %s20_s19, %s20_s19 }
  0x2d   :  { %p3265_p5 = scmp.ne.s32.totalorder %s20_s19, %s3264_s3  ;;  %p3270_p7 = scmp.lt.s32.totalorder %s3264_s3, %s3264_s3 }
  0x2f   :  { %p3271_p8 = por %p3270_p7, %p3269_p6 }
  0x31   :  { %p3272_p9 = pnand %p3271_p8, %p3265_p5 }
  0x33   :  { %3275 = shalt.err (!%p3272_p9)
}
  0x34   :  { %25 = dma.hbm_to_vmem [thread:$0]  %s3554_s0, 256, %s20_s19, [#allocation4], %s3352_s30, %s3352_s30, %s3353_s6  }
  0x35   :  { %s3276_s10 = scalar_lea.hbm %s3556_s2, 128 }
  0x36   :  { %p3277_p10 = scmp.ne.s32.totalorder %s3556_s2, %s3276_s10  ;;  %p3280_p11 = scmp.lt.u32.totalorder %s3276_s10, %s3556_s2 }
  0x38   :  { %p3282_p12 = pnand %p3280_p11, %p3277_p10 }
  0x3a   :  { %3285 = shalt.err (!%p3282_p12)
}
  0x3b   :  { %s3286_s15 = scalar_lea.vmem %s45_s22, 128  ;;  %p3291_p0 = scmp.lt.s32.totalorder %s45_s22, %s45_s22 }
  0x3c   :  { %p3287_p13 = scmp.ne.s32.totalorder %s45_s22, %s3286_s15  ;;  %p3292_p1 = scmp.lt.s32.totalorder %s3286_s15, %s3286_s15 }
  0x3e   :  { %p3293_p2 = por %p3292_p1, %p3291_p0 }
  0x40   :  { %p3294_p3 = pnand %p3293_p2, %p3287_p13 }
  0x42   :  { %3297 = shalt.err (!%p3294_p3)
}
  0x43   :  { %47 = dma.hbm_to_vmem [thread:$0]  %s3556_s2, 128, %s45_s22, [#allocation7]  }
  0x44   :  { %s3356_s1 = smov [#allocation11]   ;;  %s3298_s20 = scalar_lea.hbm %s3558_s4, 64 }
  0x45   :  { %s64_s17 = sshll.u32 %s3356_s1, 4  ;;  %p3299_p4 = scmp.ne.s32.totalorder %s3558_s4, %s3298_s20  ;;  %s65_s17 = int_to_ptr.vmem [resolvable:$true] %s64_s17 }
  0x46   :  { %p3302_p5 = scmp.lt.u32.totalorder %s3298_s20, %s3558_s4 }
  0x48   :  { %p3304_p6 = pnand %p3302_p5, %p3299_p4 }
  0x4a   :  { %3307 = shalt.err (!%p3304_p6)
}
  0x4b   :  { %s3308_s27 = scalar_lea.vmem %s65_s17, 64  ;;  %p3313_p8 = scmp.lt.s32.totalorder %s65_s17, %s65_s17 }
  0x4c   :  { %p3309_p7 = scmp.ne.s32.totalorder %s65_s17, %s3308_s27  ;;  %p3314_p9 = scmp.lt.s32.totalorder %s3308_s27, %s3308_s27 }
  0x4e   :  { %p3315_p10 = por %p3314_p9, %p3313_p8 }
  0x50   :  { %p3316_p11 = pnand %p3315_p10, %p3309_p7 }
  0x52   :  { %3319 = shalt.err (!%p3316_p11)
}
  0x53   :  { %67 = dma.hbm_to_vmem [thread:$0]  %s3558_s4, 64, %s65_s17, [#allocation10]  }
  0x54   :  { %3342 = dma.done.wait [#allocation4], 256  }
  0x55   :  { %3343 = vsyncadd [#allocation4], 4294967040 }
  0x56   :  { %3344 = dma.done.wait [#allocation7], 51328  }
  0x57   :  { %3345 = vsyncadd [#allocation7], 4294915968 }
  0x58   :  { %3346 = dma.done.wait [#allocation10], 128  }
  0x59   :  { %3347 = vsyncadd [#allocation10], 4294967168  ;;  %v3357_v0 = vmov 0.0   ;;  %v151_v1 = vld [vmem:[#allocation6 + $0x80] sm:$0xff]  ;;  %v152_v2 = vld [vmem:[#allocation6 + $0x88] sm:$0xff]  ;;  %vm99_vm0 = vcmask 1046528  }
  0x5a   :  { %83 = vst [vmem:[#allocation2] sm:$0xff] %v3357_v0  ;;  %84 = vst [vmem:[#allocation2 + $0x8] sm:$0xf] %v3357_v0  ;;  %v135_v3 = vld [vmem:[#allocation6] sm:$0xff]  ;;  %v2697_v4 = vpack.c.bf16 %v152_v2, %v151_v1  ;;  %v136_v5 = vld [vmem:[#allocation6 + $0x8] sm:$0xff]  ;;  %vm117_vm1 = vcmask 1044480  }
  0x5b   :  { %85 = vst [vmem:[#allocation2 + $0x10] sm:$0xff] %v3357_v0  ;;  %86 = vst [vmem:[#allocation2 + $0x18] sm:$0xf] %v3357_v0  ;;  %v183_v6 = vld [vmem:[#allocation6 + $0x180] sm:$0xff]  ;;  %v184_v7 = vld [vmem:[#allocation6 + $0x188] sm:$0xff]  ;;  %v2699_v8 = vpack.c.bf16 %v136_v5, %v135_v3  ;;  %vm108_vm2 = vcmask 1045504  }
  0x5c   :  { %v2729_v9 = vpack.c.bf16 %v184_v7, %v183_v6  ;;  %v167_v10 = vld [vmem:[#allocation6 + $0x100] sm:$0xff]  ;;  %v168_v11 = vld [vmem:[#allocation6 + $0x108] sm:$0xff]  ;;  %v153_v12 = vld [vmem:[#allocation6 + $0x90] sm:$0xff]  ;;  %2698 = vmatprep.subr.bf16.mxu0 %v2697_v4  ;;  %vm126_vm3 = vcmask 1043456   ;;  %s3358_s4 = smov [#allocation12]  }
  0x5d   :  { %v2731_v13 = vpack.c.bf16 %v168_v11, %v167_v10  ;;  %v154_v14 = vld [vmem:[#allocation6 + $0x98] sm:$0xff]  ;;  %v137_v15 = vld [vmem:[#allocation6 + $0x10] sm:$0xff]  ;;  %2700 = vmatpush3.bf16.msra.mxu0 %v2699_v8  ;;  %v155_v24 = vld [vmem:[#allocation6 + $0xa0] sm:$0xff]  ;;  %s2025_s28 = sshll.u32 %s3358_s4, 4  ;;  %s2026_s28 = int_to_ptr.vmem [resolvable:$true] %s2025_s28 }
  0x5e   :  { %v138_v16 = vld [vmem:[#allocation6 + $0x18] sm:$0xff]  ;;  %2730 = vmatprep.subr.bf16.mxu1 %v2729_v9  ;;  %v2701_v17 = vpack.c.bf16 %v154_v14, %v153_v12  ;;  %v185_v19 = vld [vmem:[#allocation6 + $0x190] sm:$0xff]  ;;  %v156_v25 = vld [vmem:[#allocation6 + $0xa8] sm:$0xff]  ;;  %s3320_s29 = scalar_lea.vmem %s2026_s28, 256  ;;  %p3325_p13 = scmp.lt.s32.totalorder %s2026_s28, %s2026_s28 }
  0x5f   :  { %v2703_v18 = vpack.c.bf16 %v138_v16, %v137_v15  ;;  %v186_v20 = vld [vmem:[#allocation6 + $0x198] sm:$0xff]  ;;  %v169_v21 = vld [vmem:[#allocation6 + $0x110] sm:$0xff]  ;;  %2732 = vmatpush3.bf16.msra.mxu1 %v2731_v13  ;;  %v2705_v27 = vpack.c.bf16 %v156_v25, %v155_v24  ;;  %v139_v28 = vld [vmem:[#allocation6 + $0x20] sm:$0xff]  ;;  %p3321_p12 = scmp.ne.s32.totalorder %s2026_s28, %s3320_s29  ;;  %p3326_p0 = scmp.lt.s32.totalorder %s3320_s29, %s3320_s29 }
  0x60   :  { %v2733_v22 = vpack.c.bf16 %v186_v20, %v185_v19  ;;  %v170_v23 = vld [vmem:[#allocation6 + $0x118] sm:$0xff]  ;;  %2702 = vmatprep.subr.bf16.mxu0 %v2701_v17  ;;  %v140_v29 = vld [vmem:[#allocation6 + $0x28] sm:$0xff]  ;;  %v187_v30 = vld [vmem:[#allocation6 + $0x1a0] sm:$0xff] }
  0x61   :  { %v2735_v26 = vpack.c.bf16 %v170_v23, %v169_v21  ;;  %v188_v31 = vld [vmem:[#allocation6 + $0x1a8] sm:$0xff]  ;;  %v171_v32 = vld [vmem:[#allocation6 + $0x120] sm:$0xff]  ;;  %2704 = vmatpush3.bf16.msra.mxu0 %v2703_v18  ;;  %v2707_v34 = vpack.c.bf16 %v140_v29, %v139_v28  ;;  %v157_v36 = vld [vmem:[#allocation6 + $0xb0] sm:$0xff]  ;;  %p3327_p1 = por %p3326_p0, %p3325_p13 }
  0x62   :  { %2734 = vmatprep.subr.bf16.mxu1 %v2733_v22  ;;  %v172_v33 = vld [vmem:[#allocation6 + $0x128] sm:$0xff]  ;;  %v2737_v35 = vpack.c.bf16 %v188_v31, %v187_v30  ;;  %v158_v37 = vld [vmem:[#allocation6 + $0xb8] sm:$0xff]  ;;  %v141_v38 = vld [vmem:[#allocation6 + $0x30] sm:$0xff]  ;;  %2706 = vmatprep.subr.bf16.mxu0 %v2705_v27 }
  0x63   :  { %2736 = vmatpush3.bf16.msra.mxu1 %v2735_v26  ;;  %v2739_v39 = vpack.c.bf16 %v172_v33, %v171_v32  ;;  %v2709_v40 = vpack.c.bf16 %v158_v37, %v157_v36  ;;  %v142_v41 = vld [vmem:[#allocation6 + $0x38] sm:$0xff]  ;;  %v189_v42 = vld [vmem:[#allocation6 + $0x1b0] sm:$0xff]  ;;  %v159_v47 = vld [vmem:[#allocation6 + $0xc0] sm:$0xff]  ;;  %p3328_p2 = pnand %p3327_p1, %p3321_p12 }
  0x64   :  { %v190_v43 = vld [vmem:[#allocation6 + $0x1b8] sm:$0xff]  ;;  %2738 = vmatprep.subr.bf16.mxu1 %v2737_v35  ;;  %v173_v45 = vld [vmem:[#allocation6 + $0x130] sm:$0xff]  ;;  %v160_v48 = vld [vmem:[#allocation6 + $0xc8] sm:$0xff]  ;;  %v2711_v49 = vpack.c.bf16 %v142_v41, %v141_v38 }
  0x65   :  { %v2741_v44 = vpack.c.bf16 %v190_v43, %v189_v42  ;;  %v174_v46 = vld [vmem:[#allocation6 + $0x138] sm:$0xff]  ;;  %2708 = vmatpush3.bf16.msra.mxu0 %v2707_v34  ;;  %v191_v50 = vld [vmem:[#allocation6 + $0x1c0] sm:$0xff]  ;;  %v192_v51 = vld [vmem:[#allocation6 + $0x1c8] sm:$0xff]  ;;  %v2713_v53 = vpack.c.bf16 %v160_v48, %v159_v47 }
  0x66   :  { %2710 = vmatprep.subr.bf16.mxu0 %v2709_v40  ;;  %v2743_v52 = vpack.c.bf16 %v174_v46, %v173_v45  ;;  %v143_v54 = vld [vmem:[#allocation6 + $0x40] sm:$0xff]  ;;  %v144_v55 = vld [vmem:[#allocation6 + $0x48] sm:$0xff]  ;;  %v2745_v57 = vpack.c.bf16 %v192_v51, %v191_v50  ;;  %v161_v59 = vld [vmem:[#allocation6 + $0xd0] sm:$0xff] }
  0x67   :  { %2740 = vmatpush3.bf16.msra.mxu1 %v2739_v39  ;;  %v175_v56 = vld [vmem:[#allocation6 + $0x140] sm:$0xff]  ;;  %v176_v58 = vld [vmem:[#allocation6 + $0x148] sm:$0xff]  ;;  %v162_v60 = vld [vmem:[#allocation6 + $0xd8] sm:$0xff]  ;;  %v2715_v63 = vpack.c.bf16 %v144_v55, %v143_v54 }
  0x68   :  { %2742 = vmatprep.subr.bf16.mxu1 %v2741_v44  ;;  %v193_v61 = vld [vmem:[#allocation6 + $0x1d0] sm:$0xff]  ;;  %v194_v62 = vld [vmem:[#allocation6 + $0x1d8] sm:$0xff]  ;;  %v2747_v0 = vpack.c.bf16 %v176_v58, %v175_v56  ;;  %v2717_v1 = vpack.c.bf16 %v162_v60, %v161_v59  ;;  %v163_v7 = vld [vmem:[#allocation6 + $0xe0] sm:$0xff] }
  0x69   :  { %2712 = vmatpush3.bf16.msra.mxu0 %v2711_v49  ;;  %v145_v2 = vld [vmem:[#allocation6 + $0x50] sm:$0xff]  ;;  %v146_v3 = vld [vmem:[#allocation6 + $0x58] sm:$0xff]  ;;  %v2749_v5 = vpack.c.bf16 %v194_v62, %v193_v61  ;;  %v164_v8 = vld [vmem:[#allocation6 + $0xe8] sm:$0xff] }
  0x6a   :  { %2714 = vmatprep.subr.bf16.mxu0 %v2713_v53  ;;  %v177_v4 = vld [vmem:[#allocation6 + $0x150] sm:$0xff]  ;;  %v178_v6 = vld [vmem:[#allocation6 + $0x158] sm:$0xff]  ;;  %v195_v9 = vld [vmem:[#allocation6 + $0x1e0] sm:$0xff]  ;;  %v2719_v11 = vpack.c.bf16 %v146_v3, %v145_v2  ;;  %v2721_v14 = vpack.c.bf16 %v164_v8, %v163_v7 }
  0x6b   :  { %2744 = vmatpush3.bf16.msra.mxu1 %v2743_v52  ;;  %v196_v10 = vld [vmem:[#allocation6 + $0x1e8] sm:$0xff]  ;;  %v87_v12 = vld [vmem:[#allocation3] sm:$0xff]  ;;  %v2751_v13 = vpack.c.bf16 %v178_v6, %v177_v4  ;;  %v147_v15 = vld [vmem:[#allocation6 + $0x60] sm:$0xff] }
  0x6c   :  { %2746 = vmatprep.subr.bf16.mxu1 %v2745_v57  ;;  %v148_v16 = vld [vmem:[#allocation6 + $0x68] sm:$0xff]  ;;  %v179_v17 = vld [vmem:[#allocation6 + $0x160] sm:$0xff]  ;;  %89 = vst [vmem:[#allocation2 + $0x2] sm:$0xff] %v87_v12  ;;  %v2753_v18 = vpack.c.bf16 %v196_v10, %v195_v9  ;;  %v165_v20 = vld [vmem:[#allocation6 + $0xf0] sm:$0xff] }
  0x6d   :  { %2716 = vmatpush3.bf16.msra.mxu0 %v2715_v63  ;;  %v180_v19 = vld [vmem:[#allocation6 + $0x168] sm:$0xff]  ;;  %v166_v21 = vld [vmem:[#allocation6 + $0xf8] sm:$0xff]  ;;  %v149_v22 = vld [vmem:[#allocation6 + $0x70] sm:$0xff]  ;;  %v2723_v25 = vpack.c.bf16 %v148_v16, %v147_v15 }
  0x6e   :  { %2718 = vmatprep.subr.bf16.mxu0 %v2717_v1  ;;  %v197_v23 = vld [vmem:[#allocation6 + $0x1f0] sm:$0xff]  ;;  %v198_v24 = vld [vmem:[#allocation6 + $0x1f8] sm:$0xff]  ;;  %v2755_v29 = vpack.c.bf16 %v180_v19, %v179_v17  ;;  %v2725_v30 = vpack.c.bf16 %v166_v21, %v165_v20  ;;  %v199_v31 = vld [vmem:[#allocation6 + $0x200] sm:$0xff] }
  0x6f   :  { %2748 = vmatpush3.bf16.msra.mxu1 %v2747_v0  ;;  %v150_v26 = vld [vmem:[#allocation6 + $0x78] sm:$0xff]  ;;  %v181_v27 = vld [vmem:[#allocation6 + $0x170] sm:$0xff]  ;;  %v200_v32 = vld [vmem:[#allocation6 + $0x208] sm:$0xff]  ;;  %v2757_v34 = vpack.c.bf16 %v198_v24, %v197_v23 }
  0x70   :  { %2750 = vmatprep.subr.bf16.mxu1 %v2749_v5  ;;  %v182_v28 = vld [vmem:[#allocation6 + $0x178] sm:$0xff]  ;;  %v2727_v35 = vpack.c.bf16 %v150_v26, %v149_v22  ;;  %v2761_v39 = vpack.c.bf16 %v200_v32, %v199_v31  ;;  %v201_v46 = vld [vmem:[#allocation6 + $0x210] sm:$0xff]  ;;  %v203_v56 = vld [vmem:[#allocation6 + $0x220] sm:$0xff] }
  0x71   :  { %2720 = vmatpush3.bf16.msra.mxu0 %v2719_v11  ;;  %v88_v33 = vld [vmem:[#allocation3 + $0x8] sm:$0xff]  ;;  %v2759_v38 = vpack.c.bf16 %v182_v28, %v181_v27  ;;  %v204_v57 = vld [vmem:[#allocation6 + $0x228] sm:$0xff]  ;;  %v205_v4 = vld [vmem:[#allocation6 + $0x230] sm:$0xff] }
  0x72   :  { %2722 = vmatprep.subr.bf16.mxu0 %v2721_v14  ;;  %90 = vst [vmem:[#allocation2 + $0x12] sm:$0xff] %v88_v33  ;;  %v202_v47 = vld [vmem:[#allocation6 + $0x218] sm:$0xff]  ;;  %v2769_v2 = vpack.c.bf16 %v204_v57, %v203_v56  ;;  %v207_v8 = vld [vmem:[#allocation6 + $0x240] sm:$0xff]  ;;  %v208_v9 = vld [vmem:[#allocation6 + $0x248] sm:$0xff] }
  0x73   :  { %2752 = vmatpush3.bf16.msra.mxu1 %v2751_v13  ;;  %v91_v36 = vld [vmem:[#allocation2] sm:$0xff]  ;;  %v92_v37 = vld [vmem:[#allocation2 + $0x8] sm:$0xf]  ;;  %v2765_v51 = vpack.c.bf16 %v202_v47, %v201_v46  ;;  %v2777_v10 = vpack.c.bf16 %v208_v9, %v207_v8  ;;  %v211_v14 = vld [vmem:[#allocation6 + $0x260] sm:$0xff] }
  0x74   :  { %2754 = vmatprep.subr.bf16.mxu1 %v2753_v18  ;;  %v100_v40 = vrot.slane %v91_v36, 1  ;;  %v101_v41 = vrot.slane %v92_v37, 1  ;;  %v118_v42 = vrot.slane %v91_v36, 3  ;;  %v119_v43 = vrot.slane %v92_v37, 3  ;;  %v206_v5 = vld [vmem:[#allocation6 + $0x238] sm:$0xff]  ;;  %v209_v11 = vld [vmem:[#allocation6 + $0x250] sm:$0xff] }
  0x75   :  { %2724 = vmatpush3.bf16.msra.mxu0 %v2723_v25  ;;  %v109_v44 = vrot.slane %v91_v36, 2  ;;  %v110_v45 = vrot.slane %v92_v37, 2  ;;  %v127_v54 = vrot.slane %v91_v36, 4  ;;  %v128_v55 = vrot.slane %v92_v37, 4  ;;  %v210_v12 = vld [vmem:[#allocation6 + $0x258] sm:$0xff]  ;;  %v212_v15 = vld [vmem:[#allocation6 + $0x268] sm:$0xff] }
  0x76   :  { %2726 = vmatprep.subr.bf16.mxu0 %v2725_v30  ;;  %v102_v48 = vsel %vm99_vm0, %v100_v40, %v101_v41  ;;  %v120_v49 = vsel %vm117_vm1, %v118_v42, %v119_v43  ;;  %v2773_v7 = vpack.c.bf16 %v206_v5, %v205_v4  ;;  %v2781_v13 = vpack.c.bf16 %v210_v12, %v209_v11  ;;  %v213_v17 = vld [vmem:[#allocation6 + $0x270] sm:$0xff]  ;;  %v214_v18 = vld [vmem:[#allocation6 + $0x278] sm:$0xff]  ;;  %v545_v23 = vld [vmem:[#allocation6 + $0x300] sm:$0xff] }
  0x77   :  { %2756 = vmatpush3.bf16.msra.mxu1 %v2755_v29  ;;  %284 = vmatprep.mubr.f32.mxu0 %v102_v48  ;;  %v111_v50 = vsel %vm108_vm2, %v109_v44, %v110_v45  ;;  %v129_v6 = vsel %vm126_vm3, %v127_v54, %v128_v55  ;;  %v2785_v16 = vpack.c.bf16 %v212_v15, %v211_v14  ;;  %v546_v24 = vld [vmem:[#allocation6 + $0x308] sm:$0xff]  ;;  %v529_v26 = vld [vmem:[#allocation6 + $0x280] sm:$0xff]  ;;  %v579_v40 = vld [vmem:[#allocation6 + $0x410] sm:$0xff] }
  0x78   :  { %2758 = vmatprep.subr.bf16.mxu1 %v2757_v34  ;;  %359 = vmatprep.mubr.f32.mxu1 %v120_v49  ;;  %v2789_v19 = vpack.c.bf16 %v214_v18, %v213_v17  ;;  %v2793_v25 = vpack.c.bf16 %v546_v24, %v545_v23  ;;  %v530_v27 = vld [vmem:[#allocation6 + $0x288] sm:$0xff]  ;;  %v577_v28 = vld [vmem:[#allocation6 + $0x400] sm:$0xff]  ;;  %v580_v42 = vld [vmem:[#allocation6 + $0x418] sm:$0xff] }
  0x79   :  { %2728 = vmatpush3.bf16.msra.mxu0 %v2727_v35  ;;  %v93_v52 = vld [vmem:[#allocation2 + $0x10] sm:$0xff]  ;;  %v94_v53 = vld [vmem:[#allocation2 + $0x18] sm:$0xf]  ;;  %v2795_v29 = vpack.c.bf16 %v530_v27, %v529_v26  ;;  %v547_v35 = vld [vmem:[#allocation6 + $0x310] sm:$0xff]  ;;  %v2829_v44 = vpack.c.bf16 %v580_v42, %v579_v40 }
  0x7a   :  { %2762 = vmatprep.subr.bf16.mxu0 %v2761_v39  ;;  %v103_v58 = vrot.slane %v93_v52, 1  ;;  %v104_v59 = vrot.slane %v94_v53, 1  ;;  %v121_v60 = vrot.slane %v93_v52, 3  ;;  %v122_v61 = vrot.slane %v94_v53, 3  ;;  %v578_v30 = vld [vmem:[#allocation6 + $0x408] sm:$0xff]  ;;  %v561_v31 = vld [vmem:[#allocation6 + $0x380] sm:$0xff] }
  0x7b   :  { %2760 = vmatpush3.bf16.msra.mxu1 %v2759_v38  ;;  %v112_v62 = vrot.slane %v93_v52, 2  ;;  %v113_v63 = vrot.slane %v94_v53, 2  ;;  %v130_v20 = vrot.slane %v93_v52, 4  ;;  %v131_v21 = vrot.slane %v94_v53, 4  ;;  %v562_v32 = vld [vmem:[#allocation6 + $0x388] sm:$0xff]  ;;  %v531_v38 = vld [vmem:[#allocation6 + $0x290] sm:$0xff] }
  0x7c   :  { %285 = vmatmul.mubr.f32.vlgmr.msra.gmra.mrb[0].mxu0 %v91_v36  ;;  %v105_v0 = vsel %vm99_vm0, %v103_v58, %v104_v59  ;;  %v123_v1 = vsel %vm117_vm1, %v121_v60, %v122_v61  ;;  %2794 = vmatprep.subr.bf16.mxu1 %v2793_v25  ;;  %v2825_v33 = vpack.c.bf16 %v578_v30, %v577_v28  ;;  %v548_v36 = vld [vmem:[#allocation6 + $0x318] sm:$0xff]  ;;  %v563_v43 = vld [vmem:[#allocation6 + $0x390] sm:$0xff]  ;;  %v549_v47 = vld [vmem:[#allocation6 + $0x320] sm:$0xff] }
  0x7d   :  { %2764 = vmatpush3.bf16.msra.mxu0 %v2761_v39  ;;  %289 = vmatprep.mubr.f32.mxu0 %v105_v0  ;;  %v114_v3 = vsel %vm108_vm2, %v112_v62, %v113_v63  ;;  %v132_v22 = vsel %vm126_vm3, %v130_v20, %v131_v21  ;;  %v2827_v34 = vpack.c.bf16 %v562_v32, %v561_v31  ;;  %v532_v39 = vld [vmem:[#allocation6 + $0x298] sm:$0xff]  ;;  %v550_v48 = vld [vmem:[#allocation6 + $0x328] sm:$0xff]  ;;  %v565_v55 = vld [vmem:[#allocation6 + $0x3a0] sm:$0xff] }
  0x7e   :  { %360 = vmatmul.mubr.f32.vlgmr.msra.gmra.mrb[0].mxu1 %v111_v50  ;;  %2766 = vmatprep.subr.bf16.mxu0 %v2765_v51  ;;  %v2797_v37 = vpack.c.bf16 %v548_v36, %v547_v35  ;;  %v2799_v41 = vpack.c.bf16 %v532_v39, %v531_v38  ;;  %v564_v45 = vld [vmem:[#allocation6 + $0x398] sm:$0xff]  ;;  %v2801_v49 = vpack.c.bf16 %v550_v48, %v549_v47  ;;  %v533_v50 = vld [vmem:[#allocation6 + $0x2a0] sm:$0xff]  ;;  %v582_v54 = vld [vmem:[#allocation6 + $0x428] sm:$0xff] }
  0x7f   :  { %364 = vmatprep.mubr.f32.mxu1 %v123_v1  ;;  %2796 = vmatpush3.bf16.msra.mxu1 %v2795_v29  ;;  %v2831_v46 = vpack.c.bf16 %v564_v45, %v563_v43  ;;  %v566_v56 = vld [vmem:[#allocation6 + $0x3a8] sm:$0xff]  ;;  %v551_v59 = vld [vmem:[#allocation6 + $0x330] sm:$0xff]  ;;  %v552_v60 = vld [vmem:[#allocation6 + $0x338] sm:$0xff] }
  0x80   :  { %290 = vmatmul.mubr.f32.gmra.mrb[2].mxu0 %v93_v52  ;;  %2798 = vmatprep.subr.bf16.mxu1 %v2797_v37  ;;  %v581_v52 = vld [vmem:[#allocation6 + $0x420] sm:$0xff]  ;;  %v2835_v58 = vpack.c.bf16 %v566_v56, %v565_v55  ;;  %v2805_v61 = vpack.c.bf16 %v552_v60, %v551_v59  ;;  %v535_v62 = vld [vmem:[#allocation6 + $0x2b0] sm:$0xff]  ;;  %v536_v63 = vld [vmem:[#allocation6 + $0x2b8] sm:$0xff] }
  0x81   :  { %2768 = vmatpush3.bf16.msra.mxu0 %v2765_v51  ;;  %2554 = vmatprep.mubr.f32.mxu0 %v129_v6  ;;  %v534_v51 = vld [vmem:[#allocation6 + $0x2a8] sm:$0xff]  ;;  %v2833_v57 = vpack.c.bf16 %v582_v54, %v581_v52  ;;  %v583_v0 = vld [vmem:[#allocation6 + $0x430] sm:$0xff]  ;;  %v2807_v1 = vpack.c.bf16 %v536_v63, %v535_v62  ;;  %v568_v4 = vld [vmem:[#allocation6 + $0x3b8] sm:$0xff] }
  0x82   :  { %365 = vmatmul.mubr.f32.gmra.mrb[2].mxu1 %v114_v3  ;;  %2770 = vmatprep.subr.bf16.mxu0 %v2769_v2  ;;  %v2803_v53 = vpack.c.bf16 %v534_v51, %v533_v50  ;;  %v567_v3 = vld [vmem:[#allocation6 + $0x3b0] sm:$0xff]  ;;  %v554_v8 = vld [vmem:[#allocation6 + $0x348] sm:$0xff]  ;;  %v585_v12 = vld [vmem:[#allocation6 + $0x440] sm:$0xff] }
  0x83   :  { %2800 = vmatpush3.bf16.msra.mxu1 %v2799_v41  ;;  %v2839_v6 = vpack.c.bf16 %v568_v4, %v567_v3  ;;  %v538_v11 = vld [vmem:[#allocation6 + $0x2c8] sm:$0xff]  ;;  %v569_v15 = vld [vmem:[#allocation6 + $0x3c0] sm:$0xff]  ;;  %v556_v20 = vld [vmem:[#allocation6 + $0x358] sm:$0xff] }
  0x84   :  { %2802 = vmatprep.subr.bf16.mxu1 %v2801_v49  ;;  %v586_v14 = vld [vmem:[#allocation6 + $0x448] sm:$0xff]  ;;  %v540_v23 = vld [vmem:[#allocation6 + $0x2d8] sm:$0xff]  ;;  %v587_v24 = vld [vmem:[#allocation6 + $0x450] sm:$0xff] }
  0x85   :  { %2772 = vmatpush3.bf16.msra.mxu0 %v2769_v2  ;;  %v584_v2 = vld [vmem:[#allocation6 + $0x438] sm:$0xff]  ;;  %v2841_v17 = vpack.c.bf16 %v586_v14, %v585_v12  ;;  %v571_v27 = vld [vmem:[#allocation6 + $0x3d0] sm:$0xff]  ;;  %v557_v31 = vld [vmem:[#allocation6 + $0x360] sm:$0xff] }
  0x86   :  { %2774 = vmatprep.subr.bf16.mxu0 %v2773_v7  ;;  %v2837_v5 = vpack.c.bf16 %v584_v2, %v583_v0  ;;  %v588_v26 = vld [vmem:[#allocation6 + $0x458] sm:$0xff]  ;;  %v558_v32 = vld [vmem:[#allocation6 + $0x368] sm:$0xff]  ;;  %v589_v36 = vld [vmem:[#allocation6 + $0x460] sm:$0xff] }
  0x87   :  { %2804 = vmatpush3.bf16.msra.mxu1 %v2803_v53  ;;  %v572_v28 = vld [vmem:[#allocation6 + $0x3d8] sm:$0xff]  ;;  %v2845_v29 = vpack.c.bf16 %v588_v26, %v587_v24  ;;  %v542_v35 = vld [vmem:[#allocation6 + $0x2e8] sm:$0xff]  ;;  %v573_v40 = vld [vmem:[#allocation6 + $0x3e0] sm:$0xff] }
  0x88   :  { %2806 = vmatprep.subr.bf16.mxu1 %v2805_v61  ;;  %v2847_v30 = vpack.c.bf16 %v572_v28, %v571_v27  ;;  %v590_v37 = vld [vmem:[#allocation6 + $0x468] sm:$0xff]  ;;  %v559_v42 = vld [vmem:[#allocation6 + $0x370] sm:$0xff]  ;;  %v592_v50 = vld [vmem:[#allocation6 + $0x478] sm:$0xff] }
  0x89   :  { %2776 = vmatpush3.bf16.msra.mxu0 %v2773_v7  ;;  %v553_v7 = vld [vmem:[#allocation6 + $0x340] sm:$0xff]  ;;  %v2849_v39 = vpack.c.bf16 %v590_v37, %v589_v36  ;;  %v574_v41 = vld [vmem:[#allocation6 + $0x3e8] sm:$0xff]  ;;  %v543_v45 = vld [vmem:[#allocation6 + $0x2f0] sm:$0xff] }
  0x8a   :  { %2778 = vmatprep.subr.bf16.mxu0 %v2777_v10  ;;  %v2809_v9 = vpack.c.bf16 %v554_v8, %v553_v7  ;;  %v2851_v43 = vpack.c.bf16 %v574_v41, %v573_v40  ;;  %v591_v49 = vld [vmem:[#allocation6 + $0x470] sm:$0xff]  ;;  %v576_v53 = vld [vmem:[#allocation6 + $0x3f8] sm:$0xff]  ;;  %v593_v55 = vld [vmem:[#allocation6 + $0x480] sm:$0xff] }
  0x8b   :  { %2808 = vmatpush3.bf16.msra.mxu1 %v2807_v1  ;;  %v575_v51 = vld [vmem:[#allocation6 + $0x3f0] sm:$0xff]  ;;  %v2853_v52 = vpack.c.bf16 %v592_v50, %v591_v49  ;;  %v594_v56 = vld [vmem:[#allocation6 + $0x488] sm:$0xff]  ;;  %v2039_v59 = vld [vmem:[#allocation8] ss:$0 sm:$0xff] }
  0x8c   :  { %2810 = vmatprep.subr.bf16.mxu1 %v2809_v9  ;;  %v2855_v54 = vpack.c.bf16 %v576_v53, %v575_v51  ;;  %v2040_v37 = vld [vmem:[#allocation9] ss:$0 sm:$0xff]  ;;  %v2041_v40 = vld [vmem:[#allocation11] ss:$0 sm:$0xff] }
  0x8d   :  { %2780 = vmatpush3.bf16.msra.mxu0 %v2777_v10  ;;  %v537_v10 = vld [vmem:[#allocation6 + $0x2c0] sm:$0xff] }
  0x8e   :  { %2782 = vmatprep.subr.bf16.mxu0 %v2781_v13 }
  0x91   :  { %2784 = vmatpush3.bf16.msra.mxu0 %v2781_v13  ;;  %v2811_v13 = vpack.c.bf16 %v538_v11, %v537_v10 }
  0x92   :  { %2786 = vmatprep.subr.bf16.mxu0 %v2785_v16 }
  0x93   :  { %2812 = vmatpush3.bf16.msra.mxu1 %v2811_v13 }
  0x95   :  { %2788 = vmatpush3.bf16.msra.mxu0 %v2785_v16  ;;  %v570_v16 = vld [vmem:[#allocation6 + $0x3c8] sm:$0xff] }
  0x96   :  { %2790 = vmatprep.subr.bf16.mxu0 %v2789_v19  ;;  %v2843_v18 = vpack.c.bf16 %v570_v16, %v569_v15 }
  0x99   :  { %2792 = vmatpush3.bf16.msra.mxu0 %v2789_v19  ;;  %v555_v19 = vld [vmem:[#allocation6 + $0x350] sm:$0xff] }
  0x9a   :  { %2826 = vmatprep.subr.bf16.mxu0 %v2825_v33  ;;  %v2813_v21 = vpack.c.bf16 %v556_v20, %v555_v19  ;;  %v541_v33 = vld [vmem:[#allocation6 + $0x2e0] sm:$0xff] }
  0x9b   :  { %v2819_v38 = vpack.c.bf16 %v542_v35, %v541_v33 }
  0x9c   :  { %2555 = vmatmul.mubr.f32.vlgmr.msra.gmra.mrb[4].mxu0 %v132_v22  ;;  %v539_v22 = vld [vmem:[#allocation6 + $0x2d0] sm:$0xff]  ;;  %2814 = vmatprep.subr.bf16.mxu1 %v2813_v21 }
  0x9d   :  { %2828 = vmatpush3.bf16.msra.mxu0 %v2827_v34  ;;  %v2815_v25 = vpack.c.bf16 %v540_v23, %v539_v22  ;;  %v2817_v34 = vpack.c.bf16 %v558_v32, %v557_v31 }
  0x9e   :  { %2830 = vmatprep.subr.bf16.mxu0 %v2829_v44  ;;  %v560_v44 = vld [vmem:[#allocation6 + $0x378] sm:$0xff] }
  0x9f   :  { %2816 = vmatpush3.bf16.msra.mxu1 %v2815_v25  ;;  %v2821_v47 = vpack.c.bf16 %v560_v44, %v559_v42 }
  0xa0   :  { %2818 = vmatprep.subr.bf16.mxu1 %v2817_v34 }
  0xa1   :  { %2832 = vmatpush3.bf16.msra.mxu0 %v2831_v46  ;;  %v544_v46 = vld [vmem:[#allocation6 + $0x2f8] sm:$0xff] }
  0xa2   :  { %2834 = vmatprep.subr.bf16.mxu0 %v2833_v57  ;;  %v2823_v48 = vpack.c.bf16 %v544_v46, %v543_v45  ;;  %v3463_v57 = vpack.c.bf16 %v594_v56, %v593_v55 }
  0xa3   :  { %2820 = vmatpush3.bf16.msra.mxu1 %v2819_v38 }
  0xa4   :  { %2822 = vmatprep.subr.bf16.mxu1 %v2821_v47  ;;  %v595_v47 = vld [vmem:[#allocation6 + $0x490] sm:$0xff] }
  0xa5   :  { %2836 = vmatpush3.bf16.msra.mxu0 %v2835_v58 }
  0xa6   :  { %2838 = vmatprep.subr.bf16.mxu0 %v2837_v5 }
  0xa7   :  { %2824 = vmatpush3.bf16.msra.mxu1 %v2823_v48  ;;  %v596_v48 = vld [vmem:[#allocation6 + $0x498] sm:$0xff] }
  0xa8   :  { %2858 = vmatprep.subr.bf16.mxu1 %v3463_v57  ;;  %v2861_v51 = vpack.c.bf16 %v596_v48, %v595_v47  ;;  %v924_v47 = vld [vmem:[#allocation6 + $0x510] sm:$0xff]  ;;  %v925_v48 = vld [vmem:[#allocation6 + $0x518] sm:$0xff] }
  0xa9   :  { %2840 = vmatpush3.bf16.msra.mxu0 %v2839_v6 }
  0xaa   :  { %2842 = vmatprep.subr.bf16.mxu0 %v2841_v17 }
  0xad   :  { %2844 = vmatpush3.bf16.msra.mxu0 %v2843_v18 }
  0xae   :  { %2846 = vmatprep.subr.bf16.mxu0 %v2845_v29 }
  0xb1   :  { %2848 = vmatpush3.bf16.msra.mxu0 %v2847_v30 }
  0xb2   :  { %2850 = vmatprep.subr.bf16.mxu0 %v2849_v39 }
  0xb5   :  { %2852 = vmatpush3.bf16.msra.mxu0 %v2851_v43 }
  0xb6   :  { %2854 = vmatprep.subr.bf16.mxu0 %v2853_v52 }
  0xb9   :  { %2856 = vmatpush3.bf16.msra.mxu0 %v2855_v54 }
 0x14f   :  { %v2084_v58 = vpop.f32.mrb[0].mxu0 }
 0x150   :  { %v2085_v60 = vpop.f32.mrb[1].mxu0 }
 0x151   :  { %v2122_v61 = vpop.f32.mrb[0].mxu1  ;;  %v2086_v62 = vadd.f32 %v2085_v60, %v2084_v58 }
 0x152   :  { %v2123_v63 = vpop.f32.mrb[1].mxu1 }
 0x153   :  { %v2124_v0 = vadd.f32 %v2123_v63, %v2122_v61  ;;  %v287_v1 = vadd.f32 %v2086_v62, %v2039_v59  ;;  %v2087_v2 = vpop.f32.mrb[2].mxu0 }
 0x154   :  { %v2088_v3 = vpop.f32.mrb[3].mxu0 }
 0x155   :  { %v2125_v4 = vpop.f32.mrb[2].mxu1  ;;  %v2089_v5 = vadd.f32 %v2088_v3, %v2087_v2  ;;  %v362_v7 = vadd.f32 %v2124_v0, %v287_v1 }
 0x156   :  { %v2126_v6 = vpop.f32.mrb[3].mxu1 }
 0x157   :  { %v2127_v8 = vadd.f32 %v2126_v6, %v2125_v4  ;;  %v292_v9 = vadd.f32 %v2089_v5, %v2039_v59  ;;  %v597_v6 = vld [vmem:[#allocation6 + $0x4a0] sm:$0xff] }
 0x159   :  { %v367_v10 = vadd.f32 %v2127_v8, %v292_v9 }
 0x16f   :  { %v2556_v11 = vpop.f32.mrb[4].mxu0 }
 0x170   :  { %v442_v12 = vadd.f32 %v2556_v11, %v367_v10  ;;  %v436_v13 = vpop.f32.mrb[5].mxu0 }
 0x171   :  { %v437_v14 = vadd.f32 %v436_v13, %v362_v7  ;;  %v598_v7 = vld [vmem:[#allocation6 + $0x4a8] sm:$0xff] }
 0x173   :  { %v445_v15 = vadd.f32 %v442_v12, %v437_v14 }
 0x175   :  { %v446_v16 = vrot.slane %v445_v15, 4 }
 0x177   :  { %v447_v17 = vadd.f32 %v446_v16, %v445_v15  ;;  %v600_v15 = vld [vmem:[#allocation6 + $0x4b8] sm:$0xff] }
 0x179   :  { %v448_v18 = vrot.slane %v447_v17, 2 }
 0x17b   :  { %v449_v19 = vadd.f32 %v448_v18, %v447_v17  ;;  %v602_v18 = vld [vmem:[#allocation6 + $0x4c8] sm:$0xff] }
 0x17d   :  { %v450_v20 = vrot.slane %v449_v19, 1 }
 0x17f   :  { %v451_v21 = vadd.f32 %v450_v20, %v449_v19  ;;  %v603_v20 = vld [vmem:[#allocation6 + $0x4d0] sm:$0xff] }
 0x181   :  { %v453_v22 = vmul.f32 0.0625, %v451_v21  ;;  %v604_v21 = vld [vmem:[#allocation6 + $0x4d8] sm:$0xff] }
 0x183   :  { %v454_v23 = vsub.f32 %v437_v14, %v453_v22  ;;  %v455_v24 = vsub.f32 %v442_v12, %v453_v22  ;;  %v2865_v12 = vpack.c.bf16 %v598_v7, %v597_v6  ;;  %v599_v14 = vld [vmem:[#allocation6 + $0x4b0] sm:$0xff]  ;;  %v2877_v22 = vpack.c.bf16 %v604_v21, %v603_v20  ;;  %v945_v6 = vld [vmem:[#allocation6 + $0x5b8] sm:$0xff]  ;;  %v931_v20 = vld [vmem:[#allocation6 + $0x548] sm:$0xff] }
 0x184   :  { %v2869_v17 = vpack.c.bf16 %v600_v15, %v599_v14  ;;  %v961_v14 = vld [vmem:[#allocation6 + $0x638] sm:$0xff]  ;;  %v978_v21 = vld [vmem:[#allocation6 + $0x6c0] sm:$0xff] }
 0x185   :  { %v456_v25 = vmul.f32 %v454_v23, %v454_v23  ;;  %v457_v26 = vmul.f32 %v455_v24, %v455_v24 }
 0x187   :  { %v458_v27 = vadd.f32 %v457_v26, %v456_v25  ;;  %v607_v26 = vld [vmem:[#allocation6 + $0x4f0] sm:$0xff] }
 0x189   :  { %v459_v28 = vrot.slane %v458_v27, 4 }
 0x18b   :  { %v460_v29 = vadd.f32 %v459_v28, %v458_v27  ;;  %v608_v27 = vld [vmem:[#allocation6 + $0x4f8] sm:$0xff] }
 0x18c   :  { %v2885_v28 = vpack.c.bf16 %v608_v27, %v607_v26 }
 0x18d   :  { %v461_v30 = vrot.slane %v460_v29, 2 }
 0x18f   :  { %v462_v31 = vadd.f32 %v461_v30, %v460_v29 }
 0x191   :  { %v463_v32 = vrot.slane %v462_v31, 1 }
 0x193   :  { %v464_v33 = vadd.f32 %v463_v32, %v462_v31  ;;  %v938_v32 = vld [vmem:[#allocation6 + $0x580] sm:$0xff] }
 0x195   :  { %v465_v34 = vmul.f32 0.0625, %v464_v33  ;;  %v939_v33 = vld [vmem:[#allocation6 + $0x588] sm:$0xff] }
 0x197   :  { %v466_v35 = vadd.f32 1e-05, %v465_v34  ;;  %v2889_v34 = vpack.c.bf16 %v939_v33, %v938_v32  ;;  %v933_v32 = vld [vmem:[#allocation6 + $0x558] sm:$0xff]  ;;  %v980_v33 = vld [vmem:[#allocation6 + $0x6d0] sm:$0xff] }
 0x199   :  { %3186 = vrsqrt.f32 %v466_v35  ;;  %v922_v35 = vld [vmem:[#allocation6 + $0x500] sm:$0xff]  ;;  %2890 = vmatprep.subr.bf16.mxu0 %v2889_v34 }
 0x1a3   :  { %v3187_v36 = vpop.eup %3186 }
 0x1a4   :  { %v468_v38 = vmul.f32 %v3187_v36, %v454_v23  ;;  %v469_v39 = vmul.f32 %v3187_v36, %v455_v24  ;;  %v605_v23 = vld [vmem:[#allocation6 + $0x4e0] sm:$0xff]  ;;  %v606_v24 = vld [vmem:[#allocation6 + $0x4e8] sm:$0xff] }
 0x1a5   :  { %v2881_v25 = vpack.c.bf16 %v606_v24, %v605_v23  ;;  %v923_v36 = vld [vmem:[#allocation6 + $0x508] sm:$0xff]  ;;  %v962_v24 = vld [vmem:[#allocation6 + $0x640] sm:$0xff] }
 0x1a6   :  { %v475_v41 = vmul.f32 %v2040_v37, %v468_v38  ;;  %v476_v42 = vmul.f32 %v2040_v37, %v469_v39  ;;  %v970_v37 = vld [vmem:[#allocation6 + $0x680] sm:$0xff]  ;;  %v2891_v38 = vpack.c.bf16 %v923_v36, %v922_v35  ;;  %v971_v39 = vld [vmem:[#allocation6 + $0x688] sm:$0xff]  ;;  %v981_v35 = vld [vmem:[#allocation6 + $0x6d8] sm:$0xff] }
 0x1a7   :  { %v979_v23 = vld [vmem:[#allocation6 + $0x6c8] sm:$0xff]  ;;  %v964_v36 = vld [vmem:[#allocation6 + $0x650] sm:$0xff] }
 0x1a8   :  { %v482_v43 = vadd.f32 %v2041_v40, %v475_v41  ;;  %v483_v44 = vadd.f32 %v2041_v40, %v476_v42  ;;  %v954_v40 = vld [vmem:[#allocation6 + $0x600] sm:$0xff]  ;;  %v955_v41 = vld [vmem:[#allocation6 + $0x608] sm:$0xff]  ;;  %v2921_v42 = vpack.c.bf16 %v971_v39, %v970_v37  ;;  %v2937_v26 = vpack.c.bf16 %v979_v23, %v978_v21  ;;  %v965_v37 = vld [vmem:[#allocation6 + $0x658] sm:$0xff] }
 0x1a9   :  { %v2943_v39 = vpack.c.bf16 %v965_v37, %v964_v36 }
 0x1aa   :  { %3188 = vtanh.f32 %v482_v43  ;;  %v2923_v43 = vpack.c.bf16 %v955_v41, %v954_v40  ;;  %v950_v40 = vld [vmem:[#allocation6 + $0x5e0] sm:$0xff]  ;;  %v951_v41 = vld [vmem:[#allocation6 + $0x5e8] sm:$0xff] }
 0x1ab   :  { %3190 = vtanh.f32 %v483_v44  ;;  %v940_v44 = vld [vmem:[#allocation6 + $0x590] sm:$0xff] }
 0x1b4   :  { %v3189_v45 = vpop.eup %3188 }
 0x1b5   :  { %v3191_v46 = vpop.eup %3190  ;;  %486 = vst [vmem:[#allocation2 + $0x2] sm:$0xff] %v3189_v45  ;;  %v941_v45 = vld [vmem:[#allocation6 + $0x598] sm:$0xff] }
 0x1b6   :  { %487 = vst [vmem:[#allocation2 + $0x12] sm:$0xff] %v3191_v46  ;;  %v2893_v46 = vpack.c.bf16 %v941_v45, %v940_v44  ;;  %v935_v44 = vld [vmem:[#allocation6 + $0x568] sm:$0xff]  ;;  %v982_v45 = vld [vmem:[#allocation6 + $0x6e0] sm:$0xff] }
 0x1bc   :  { %v488_v49 = vld [vmem:[#allocation2] sm:$0xff]  ;;  %v489_v50 = vld [vmem:[#allocation2 + $0x8] sm:$0xf] }
 0x1bd   :  { %v496_v52 = vrot.slane %v488_v49, 1  ;;  %v497_v53 = vrot.slane %v489_v50, 1  ;;  %v512_v54 = vrot.slane %v488_v49, 3  ;;  %v513_v55 = vrot.slane %v489_v50, 3  ;;  %v3466_v56 = vld [vmem:[#allocation2 + $0x10] sm:$0xff] }
 0x1be   :  { %v504_v58 = vrot.slane %v488_v49, 2  ;;  %v505_v59 = vrot.slane %v489_v50, 2  ;;  %v491_v60 = vld [vmem:[#allocation2 + $0x18] sm:$0xf]  ;;  %v499_v61 = vrot.slane %v3466_v56, 1  ;;  %v515_v62 = vrot.slane %v3466_v56, 3 }
 0x1bf   :  { %v498_v63 = vsel %vm99_vm0, %v496_v52, %v497_v53  ;;  %v514_v0 = vsel %vm117_vm1, %v512_v54, %v513_v55  ;;  %v500_v1 = vrot.slane %v491_v60, 1  ;;  %v516_v2 = vrot.slane %v491_v60, 3  ;;  %v956_v52 = vld [vmem:[#allocation6 + $0x610] sm:$0xff]  ;;  %v957_v54 = vld [vmem:[#allocation6 + $0x618] sm:$0xff] }
 0x1c0   :  { %678 = vmatprep.mubr.f32.mxu1 %v498_v63  ;;  %753 = vmatprep.mubr.f32.mxu0 %v514_v0  ;;  %v506_v3 = vsel %vm108_vm2, %v504_v58, %v505_v59  ;;  %v507_v4 = vrot.slane %v3466_v56, 2  ;;  %v508_v5 = vrot.slane %v491_v60, 2  ;;  %v520_v9 = vrot.slane %v488_v49, 4  ;;  %v943_v58 = vld [vmem:[#allocation6 + $0x5a8] sm:$0xff] }
 0x1c1   :  { %679 = vmatmul.mubr.f32.vlgmr.msra.gmra.mrb[4].mxu1 %v488_v49  ;;  %754 = vmatmul.mubr.f32.vlgmr.msra.gmra.mrb[6].mxu0 %v506_v3  ;;  %v501_v8 = vsel %vm99_vm0, %v499_v61, %v500_v1  ;;  %v521_v10 = vrot.slane %v489_v50, 4  ;;  %v517_v11 = vsel %vm117_vm1, %v515_v62, %v516_v2  ;;  %v523_v29 = vrot.slane %v3466_v56, 4  ;;  %v972_v50 = vld [vmem:[#allocation6 + $0x690] sm:$0xff]  ;;  %v927_v61 = vld [vmem:[#allocation6 + $0x528] sm:$0xff]  ;;  %v974_v62 = vld [vmem:[#allocation6 + $0x6a0] sm:$0xff] }
 0x1c2   :  { %2860 = vmatpush3.bf16.msra.mxu1 %v3463_v57  ;;  %683 = vmatprep.mubr.f32.mxu1 %v501_v8  ;;  %v509_v13 = vsel %vm108_vm2, %v507_v4, %v508_v5  ;;  %v601_v57 = vld [vmem:[#allocation6 + $0x4c0] sm:$0xff]  ;;  %v524_v30 = vrot.slane %v491_v60, 4  ;;  %v2895_v49 = vpack.c.bf16 %v925_v48, %v924_v47  ;;  %v2927_v55 = vpack.c.bf16 %v957_v54, %v956_v52  ;;  %v975_v0 = vld [vmem:[#allocation6 + $0x6a8] sm:$0xff]  ;;  %v944_v5 = vld [vmem:[#allocation6 + $0x5b0] sm:$0xff] }
 0x1c3   :  { %758 = vmatprep.mubr.f32.mxu0 %v517_v11  ;;  %2862 = vmatprep.subr.bf16.mxu1 %v2861_v51  ;;  %v522_v16 = vsel %vm126_vm3, %v520_v9, %v521_v10  ;;  %v2873_v19 = vpack.c.bf16 %v602_v18, %v601_v57  ;;  %v926_v60 = vld [vmem:[#allocation6 + $0x520] sm:$0xff]  ;;  %v959_v2 = vld [vmem:[#allocation6 + $0x628] sm:$0xff]  ;;  %v2929_v3 = vpack.c.bf16 %v975_v0, %v974_v62  ;;  %v928_v8 = vld [vmem:[#allocation6 + $0x530] sm:$0xff] }
 0x1c4   :  { %v525_v31 = vsel %vm126_vm3, %v523_v29, %v524_v30  ;;  %2892 = vmatpush3.bf16.msra.mxu0 %v2891_v38  ;;  %v2899_v63 = vpack.c.bf16 %v927_v61, %v926_v60  ;;  %v958_v1 = vld [vmem:[#allocation6 + $0x620] sm:$0xff]  ;;  %v2901_v7 = vpack.c.bf16 %v945_v6, %v944_v5  ;;  %v929_v9 = vld [vmem:[#allocation6 + $0x538] sm:$0xff]  ;;  %v976_v10 = vld [vmem:[#allocation6 + $0x6b0] sm:$0xff]  ;;  %v2941_v38 = vpack.c.bf16 %v981_v35, %v980_v33 }
 0x1c5   :  { %684 = vmatmul.mubr.f32.gmra.mrb[6].mxu1 %v3466_v56  ;;  %759 = vmatmul.mubr.f32.gmra.mrb[8].mxu0 %v509_v13  ;;  %v942_v56 = vld [vmem:[#allocation6 + $0x5a0] sm:$0xff]  ;;  %v2931_v4 = vpack.c.bf16 %v959_v2, %v958_v1  ;;  %v2903_v11 = vpack.c.bf16 %v929_v9, %v928_v8  ;;  %v960_v13 = vld [vmem:[#allocation6 + $0x630] sm:$0xff]  ;;  %v947_v57 = vld [vmem:[#allocation6 + $0x5c8] sm:$0xff] }
 0x1c6   :  { %2864 = vmatpush3.bf16.msra.mxu1 %v2861_v51  ;;  %2589 = vmatprep.mubr.f32.mxu1 %v522_v16  ;;  %v973_v51 = vld [vmem:[#allocation6 + $0x698] sm:$0xff]  ;;  %v2897_v59 = vpack.c.bf16 %v943_v58, %v942_v56  ;;  %v2935_v16 = vpack.c.bf16 %v961_v14, %v960_v13  ;;  %v936_v54 = vld [vmem:[#allocation6 + $0x570] sm:$0xff]  ;;  %v986_v1 = vld [vmem:[#allocation6 + $0x700] sm:$0xff] }
 0x1c7   :  { %2866 = vmatprep.subr.bf16.mxu1 %v2865_v12  ;;  %2894 = vmatprep.subr.bf16.mxu0 %v2893_v46  ;;  %v2925_v53 = vpack.c.bf16 %v973_v51, %v972_v50  ;;  %v949_v29 = vld [vmem:[#allocation6 + $0x5d8] sm:$0xff]  ;;  %v983_v46 = vld [vmem:[#allocation6 + $0x6e8] sm:$0xff]  ;;  %v952_v51 = vld [vmem:[#allocation6 + $0x5f0] sm:$0xff] }
 0x1c8   :  { %2896 = vmatpush3.bf16.msra.mxu0 %v2895_v49  ;;  %v2945_v48 = vpack.c.bf16 %v983_v46, %v982_v45  ;;  %v966_v49 = vld [vmem:[#allocation6 + $0x660] sm:$0xff]  ;;  %v967_v50 = vld [vmem:[#allocation6 + $0x668] sm:$0xff]  ;;  %v984_v58 = vld [vmem:[#allocation6 + $0x6f0] sm:$0xff] }
 0x1c9   :  { %2898 = vmatprep.subr.bf16.mxu0 %v2897_v59  ;;  %v2947_v52 = vpack.c.bf16 %v967_v50, %v966_v49  ;;  %v985_v59 = vld [vmem:[#allocation6 + $0x6f8] sm:$0xff]  ;;  %v968_v60 = vld [vmem:[#allocation6 + $0x670] sm:$0xff]  ;;  %v987_v2 = vld [vmem:[#allocation6 + $0x708] sm:$0xff] }
 0x1ca   :  { %2868 = vmatpush3.bf16.msra.mxu1 %v2865_v12  ;;  %v977_v12 = vld [vmem:[#allocation6 + $0x6b8] sm:$0xff]  ;;  %v2949_v62 = vpack.c.bf16 %v985_v59, %v984_v58  ;;  %v2042_v6 = vld [vmem:[#allocation8 + $0x1] ss:$0 sm:$0xff]  ;;  %v2043_v46 = vld [vmem:[#allocation9 + $0x1] ss:$0 sm:$0xff] }
 0x1cb   :  { %2870 = vmatprep.subr.bf16.mxu1 %v2869_v17  ;;  %v2933_v15 = vpack.c.bf16 %v977_v12, %v976_v10  ;;  %v2044_v49 = vld [vmem:[#allocation11 + $0x1] ss:$0 sm:$0xff]  ;;  %v989_v58 = vld [vmem:[#allocation6 + $0x718] sm:$0xff] }
 0x1cc   :  { %2900 = vmatpush3.bf16.msra.mxu0 %v2899_v63  ;;  %v969_v63 = vld [vmem:[#allocation6 + $0x678] sm:$0xff] }
 0x1cd   :  { %2902 = vmatprep.subr.bf16.mxu0 %v2901_v7  ;;  %v2951_v0 = vpack.c.bf16 %v969_v63, %v968_v60 }
 0x1ce   :  { %2872 = vmatpush3.bf16.msra.mxu1 %v2869_v17  ;;  %v946_v17 = vld [vmem:[#allocation6 + $0x5c0] sm:$0xff] }
 0x1cf   :  { %2874 = vmatprep.subr.bf16.mxu1 %v2873_v19  ;;  %v2905_v18 = vpack.c.bf16 %v947_v57, %v946_v17 }
 0x1d0   :  { %2904 = vmatpush3.bf16.msra.mxu0 %v2903_v11 }
 0x1d1   :  { %2906 = vmatprep.subr.bf16.mxu0 %v2905_v18 }
 0x1d2   :  { %2876 = vmatpush3.bf16.msra.mxu1 %v2873_v19  ;;  %v930_v19 = vld [vmem:[#allocation6 + $0x540] sm:$0xff] }
 0x1d3   :  { %2878 = vmatprep.subr.bf16.mxu1 %v2877_v22 }
 0x1d6   :  { %2880 = vmatpush3.bf16.msra.mxu1 %v2877_v22  ;;  %v2907_v22 = vpack.c.bf16 %v931_v20, %v930_v19 }
 0x1d7   :  { %2882 = vmatprep.subr.bf16.mxu1 %v2881_v25 }
 0x1d8   :  { %2908 = vmatpush3.bf16.msra.mxu0 %v2907_v22 }
 0x1da   :  { %2884 = vmatpush3.bf16.msra.mxu1 %v2881_v25  ;;  %v963_v25 = vld [vmem:[#allocation6 + $0x648] sm:$0xff] }
 0x1db   :  { %2886 = vmatprep.subr.bf16.mxu1 %v2885_v28  ;;  %v2939_v27 = vpack.c.bf16 %v963_v25, %v962_v24 }
 0x1de   :  { %2888 = vmatpush3.bf16.msra.mxu1 %v2885_v28  ;;  %v948_v28 = vld [vmem:[#allocation6 + $0x5d0] sm:$0xff] }
 0x1df   :  { %2922 = vmatprep.subr.bf16.mxu1 %v2921_v42  ;;  %v2909_v30 = vpack.c.bf16 %v949_v29, %v948_v28  ;;  %v934_v42 = vld [vmem:[#allocation6 + $0x560] sm:$0xff] }
 0x1e0   :  { %v2915_v47 = vpack.c.bf16 %v935_v44, %v934_v42 }
 0x1e1   :  { %2590 = vmatmul.mubr.f32.vlgmr.msra.gmra.mrb[8].mxu1 %v525_v31  ;;  %v932_v31 = vld [vmem:[#allocation6 + $0x550] sm:$0xff]  ;;  %2910 = vmatprep.subr.bf16.mxu0 %v2909_v30 }
 0x1e2   :  { %2924 = vmatpush3.bf16.msra.mxu1 %v2923_v43  ;;  %v2911_v34 = vpack.c.bf16 %v933_v32, %v932_v31  ;;  %v2913_v43 = vpack.c.bf16 %v951_v41, %v950_v40 }
 0x1e3   :  { %2926 = vmatprep.subr.bf16.mxu1 %v2925_v53  ;;  %v953_v53 = vld [vmem:[#allocation6 + $0x5f8] sm:$0xff] }
 0x1e4   :  { %2912 = vmatpush3.bf16.msra.mxu0 %v2911_v34  ;;  %v2917_v56 = vpack.c.bf16 %v953_v53, %v952_v51 }
 0x1e5   :  { %2914 = vmatprep.subr.bf16.mxu0 %v2913_v43 }
 0x1e6   :  { %2928 = vmatpush3.bf16.msra.mxu1 %v2927_v55  ;;  %v937_v55 = vld [vmem:[#allocation6 + $0x578] sm:$0xff] }
 0x1e7   :  { %2930 = vmatprep.subr.bf16.mxu1 %v2929_v3  ;;  %v2919_v61 = vpack.c.bf16 %v937_v55, %v936_v54  ;;  %v3482_v3 = vpack.c.bf16 %v987_v2, %v986_v1 }
 0x1e8   :  { %2916 = vmatpush3.bf16.msra.mxu0 %v2915_v47 }
 0x1e9   :  { %2918 = vmatprep.subr.bf16.mxu0 %v2917_v56  ;;  %v988_v56 = vld [vmem:[#allocation6 + $0x710] sm:$0xff] }
 0x1ea   :  { %2932 = vmatpush3.bf16.msra.mxu1 %v2931_v4 }
 0x1eb   :  { %2934 = vmatprep.subr.bf16.mxu1 %v2933_v15 }
 0x1ec   :  { %2920 = vmatpush3.bf16.msra.mxu0 %v2919_v61  ;;  %v2957_v61 = vpack.c.bf16 %v989_v58, %v988_v56  ;;  %v1317_v56 = vld [vmem:[#allocation6 + $0x790] sm:$0xff]  ;;  %v1318_v58 = vld [vmem:[#allocation6 + $0x798] sm:$0xff] }
 0x1ed   :  { %2954 = vmatprep.subr.bf16.mxu0 %v3482_v3 }
 0x1ee   :  { %2936 = vmatpush3.bf16.msra.mxu1 %v2935_v16 }
 0x1ef   :  { %2938 = vmatprep.subr.bf16.mxu1 %v2937_v26 }
 0x1f2   :  { %2940 = vmatpush3.bf16.msra.mxu1 %v2939_v27 }
 0x1f3   :  { %2942 = vmatprep.subr.bf16.mxu1 %v2941_v38 }
 0x1f6   :  { %2944 = vmatpush3.bf16.msra.mxu1 %v2943_v39 }
 0x1f7   :  { %2946 = vmatprep.subr.bf16.mxu1 %v2945_v48 }
 0x1fa   :  { %2948 = vmatpush3.bf16.msra.mxu1 %v2947_v52 }
 0x1fb   :  { %2950 = vmatprep.subr.bf16.mxu1 %v2949_v62 }
 0x1fe   :  { %2952 = vmatpush3.bf16.msra.mxu1 %v2951_v0 }
 0x294   :  { %v2178_v4 = vpop.f32.mrb[4].mxu1  ;;  %v2216_v5 = vpop.f32.mrb[6].mxu0 }
 0x295   :  { %v2179_v7 = vpop.f32.mrb[5].mxu1  ;;  %v2217_v8 = vpop.f32.mrb[7].mxu0 }
 0x296   :  { %v2180_v9 = vadd.f32 %v2179_v7, %v2178_v4  ;;  %v2218_v10 = vadd.f32 %v2217_v8, %v2216_v5 }
 0x298   :  { %v681_v11 = vadd.f32 %v2180_v9, %v2042_v6  ;;  %v2181_v12 = vpop.f32.mrb[6].mxu1  ;;  %v2219_v13 = vpop.f32.mrb[8].mxu0 }
 0x299   :  { %v2182_v14 = vpop.f32.mrb[7].mxu1  ;;  %v2220_v15 = vpop.f32.mrb[9].mxu0 }
 0x29a   :  { %v2183_v16 = vadd.f32 %v2182_v14, %v2181_v12  ;;  %v2221_v17 = vadd.f32 %v2220_v15, %v2219_v13  ;;  %v756_v57 = vadd.f32 %v2218_v10, %v681_v11 }
 0x29c   :  { %v686_v18 = vadd.f32 %v2183_v16, %v2042_v6  ;;  %v990_v16 = vld [vmem:[#allocation6 + $0x720] sm:$0xff] }
 0x29e   :  { %v761_v19 = vadd.f32 %v2221_v17, %v686_v18  ;;  %v991_v17 = vld [vmem:[#allocation6 + $0x728] sm:$0xff] }
 0x2b4   :  { %v2591_v20 = vpop.f32.mrb[8].mxu1 }
 0x2b5   :  { %v836_v21 = vadd.f32 %v2591_v20, %v761_v19  ;;  %v830_v22 = vpop.f32.mrb[9].mxu1 }
 0x2b6   :  { %v831_v23 = vadd.f32 %v830_v22, %v756_v57 }
 0x2b8   :  { %v839_v24 = vadd.f32 %v836_v21, %v831_v23 }
 0x2ba   :  { %v840_v25 = vrot.slane %v839_v24, 4 }
 0x2bc   :  { %v841_v26 = vadd.f32 %v840_v25, %v839_v24  ;;  %v993_v24 = vld [vmem:[#allocation6 + $0x738] sm:$0xff] }
 0x2be   :  { %v842_v27 = vrot.slane %v841_v26, 2 }
 0x2c0   :  { %v843_v28 = vadd.f32 %v842_v27, %v841_v26  ;;  %v995_v27 = vld [vmem:[#allocation6 + $0x748] sm:$0xff] }
 0x2c2   :  { %v844_v29 = vrot.slane %v843_v28, 1 }
 0x2c4   :  { %v845_v30 = vadd.f32 %v844_v29, %v843_v28  ;;  %v996_v29 = vld [vmem:[#allocation6 + $0x750] sm:$0xff] }
 0x2c6   :  { %v846_v31 = vmul.f32 0.0625, %v845_v30  ;;  %v997_v30 = vld [vmem:[#allocation6 + $0x758] sm:$0xff] }
 0x2c8   :  { %v847_v32 = vsub.f32 %v831_v23, %v846_v31  ;;  %v848_v33 = vsub.f32 %v836_v21, %v846_v31  ;;  %v2961_v21 = vpack.c.bf16 %v991_v17, %v990_v16  ;;  %v992_v23 = vld [vmem:[#allocation6 + $0x730] sm:$0xff]  ;;  %v2973_v31 = vpack.c.bf16 %v997_v30, %v996_v29  ;;  %v1338_v16 = vld [vmem:[#allocation6 + $0x838] sm:$0xff]  ;;  %v1324_v29 = vld [vmem:[#allocation6 + $0x7c8] sm:$0xff] }
 0x2c9   :  { %v2965_v26 = vpack.c.bf16 %v993_v24, %v992_v23  ;;  %v1354_v23 = vld [vmem:[#allocation6 + $0x8b8] sm:$0xff]  ;;  %v1371_v30 = vld [vmem:[#allocation6 + $0x940] sm:$0xff] }
 0x2ca   :  { %v849_v34 = vmul.f32 %v847_v32, %v847_v32  ;;  %v850_v35 = vmul.f32 %v848_v33, %v848_v33 }
 0x2cc   :  { %v851_v36 = vadd.f32 %v850_v35, %v849_v34  ;;  %v1000_v35 = vld [vmem:[#allocation6 + $0x770] sm:$0xff] }
 0x2ce   :  { %v852_v37 = vrot.slane %v851_v36, 4 }
 0x2d0   :  { %v853_v38 = vadd.f32 %v852_v37, %v851_v36  ;;  %v1001_v36 = vld [vmem:[#allocation6 + $0x778] sm:$0xff] }
 0x2d1   :  { %v2981_v37 = vpack.c.bf16 %v1001_v36, %v1000_v35 }
 0x2d2   :  { %v854_v39 = vrot.slane %v853_v38, 2 }
 0x2d4   :  { %v855_v40 = vadd.f32 %v854_v39, %v853_v38 }
 0x2d6   :  { %v856_v41 = vrot.slane %v855_v40, 1 }
 0x2d8   :  { %v857_v42 = vadd.f32 %v856_v41, %v855_v40  ;;  %v1331_v41 = vld [vmem:[#allocation6 + $0x800] sm:$0xff] }
 0x2da   :  { %v858_v43 = vmul.f32 0.0625, %v857_v42  ;;  %v1332_v42 = vld [vmem:[#allocation6 + $0x808] sm:$0xff] }
 0x2dc   :  { %v859_v44 = vadd.f32 1e-05, %v858_v43  ;;  %v2985_v43 = vpack.c.bf16 %v1332_v42, %v1331_v41  ;;  %v1326_v41 = vld [vmem:[#allocation6 + $0x7d8] sm:$0xff]  ;;  %v1373_v42 = vld [vmem:[#allocation6 + $0x950] sm:$0xff] }
 0x2de   :  { %3192 = vrsqrt.f32 %v859_v44  ;;  %v1315_v44 = vld [vmem:[#allocation6 + $0x780] sm:$0xff]  ;;  %2986 = vmatprep.subr.bf16.mxu1 %v2985_v43 }
 0x2e8   :  { %v3193_v45 = vpop.eup %3192 }
 0x2e9   :  { %v861_v47 = vmul.f32 %v3193_v45, %v847_v32  ;;  %v862_v48 = vmul.f32 %v3193_v45, %v848_v33  ;;  %v998_v32 = vld [vmem:[#allocation6 + $0x760] sm:$0xff]  ;;  %v999_v33 = vld [vmem:[#allocation6 + $0x768] sm:$0xff] }
 0x2ea   :  { %v2977_v34 = vpack.c.bf16 %v999_v33, %v998_v32  ;;  %v1316_v45 = vld [vmem:[#allocation6 + $0x788] sm:$0xff]  ;;  %v1355_v33 = vld [vmem:[#allocation6 + $0x8c0] sm:$0xff] }
 0x2eb   :  { %v868_v50 = vmul.f32 %v2043_v46, %v861_v47  ;;  %v869_v51 = vmul.f32 %v2043_v46, %v862_v48  ;;  %v1363_v46 = vld [vmem:[#allocation6 + $0x900] sm:$0xff]  ;;  %v2987_v47 = vpack.c.bf16 %v1316_v45, %v1315_v44  ;;  %v1364_v48 = vld [vmem:[#allocation6 + $0x908] sm:$0xff]  ;;  %v1374_v44 = vld [vmem:[#allocation6 + $0x958] sm:$0xff] }
 0x2ec   :  { %v1372_v32 = vld [vmem:[#allocation6 + $0x948] sm:$0xff]  ;;  %v1357_v45 = vld [vmem:[#allocation6 + $0x8d0] sm:$0xff] }
 0x2ed   :  { %v875_v52 = vadd.f32 %v2044_v49, %v868_v50  ;;  %v876_v53 = vadd.f32 %v2044_v49, %v869_v51  ;;  %v1347_v49 = vld [vmem:[#allocation6 + $0x880] sm:$0xff]  ;;  %v1348_v50 = vld [vmem:[#allocation6 + $0x888] sm:$0xff]  ;;  %v3017_v51 = vpack.c.bf16 %v1364_v48, %v1363_v46  ;;  %v3033_v35 = vpack.c.bf16 %v1372_v32, %v1371_v30  ;;  %v1358_v46 = vld [vmem:[#allocation6 + $0x8d8] sm:$0xff] }
 0x2ee   :  { %v3039_v48 = vpack.c.bf16 %v1358_v46, %v1357_v45 }
 0x2ef   :  { %3194 = vtanh.f32 %v875_v52  ;;  %v3019_v52 = vpack.c.bf16 %v1348_v50, %v1347_v49  ;;  %v1343_v49 = vld [vmem:[#allocation6 + $0x860] sm:$0xff]  ;;  %v1344_v50 = vld [vmem:[#allocation6 + $0x868] sm:$0xff] }
 0x2f0   :  { %3196 = vtanh.f32 %v876_v53  ;;  %v1333_v53 = vld [vmem:[#allocation6 + $0x810] sm:$0xff] }
 0x2f9   :  { %v3195_v54 = vpop.eup %3194 }
 0x2fa   :  { %v3197_v55 = vpop.eup %3196  ;;  %879 = vst [vmem:[#allocation2 + $0x2] sm:$0xff] %v3195_v54  ;;  %v1334_v54 = vld [vmem:[#allocation6 + $0x818] sm:$0xff] }
 0x2fb   :  { %880 = vst [vmem:[#allocation2 + $0x12] sm:$0xff] %v3197_v55  ;;  %v2989_v55 = vpack.c.bf16 %v1334_v54, %v1333_v53  ;;  %v1328_v53 = vld [vmem:[#allocation6 + $0x7e8] sm:$0xff]  ;;  %v1375_v54 = vld [vmem:[#allocation6 + $0x960] sm:$0xff] }
 0x301   :  { %v881_v59 = vld [vmem:[#allocation2] sm:$0xff]  ;;  %v882_v60 = vld [vmem:[#allocation2 + $0x8] sm:$0xf] }
 0x302   :  { %v889_v62 = vrot.slane %v881_v59, 1  ;;  %v890_v63 = vrot.slane %v882_v60, 1  ;;  %v905_v0 = vrot.slane %v881_v59, 3  ;;  %v906_v1 = vrot.slane %v882_v60, 3  ;;  %v3485_v2 = vld [vmem:[#allocation2 + $0x10] sm:$0xff] }
 0x303   :  { %v897_v4 = vrot.slane %v881_v59, 2  ;;  %v898_v5 = vrot.slane %v882_v60, 2  ;;  %v884_v6 = vld [vmem:[#allocation2 + $0x18] sm:$0xf]  ;;  %v892_v7 = vrot.slane %v3485_v2, 1  ;;  %v908_v8 = vrot.slane %v3485_v2, 3 }
 0x304   :  { %v891_v9 = vsel %vm99_vm0, %v889_v62, %v890_v63  ;;  %v907_v10 = vsel %vm117_vm1, %v905_v0, %v906_v1  ;;  %v893_v11 = vrot.slane %v884_v6, 1  ;;  %v909_v12 = vrot.slane %v884_v6, 3  ;;  %v1349_v62 = vld [vmem:[#allocation6 + $0x890] sm:$0xff]  ;;  %v1350_v0 = vld [vmem:[#allocation6 + $0x898] sm:$0xff] }
 0x305   :  { %1071 = vmatprep.mubr.f32.mxu0 %v891_v9  ;;  %1146 = vmatprep.mubr.f32.mxu1 %v907_v10  ;;  %v899_v13 = vsel %vm108_vm2, %v897_v4, %v898_v5  ;;  %v900_v14 = vrot.slane %v3485_v2, 2  ;;  %v901_v15 = vrot.slane %v884_v6, 2  ;;  %v913_v18 = vrot.slane %v881_v59, 4  ;;  %v1336_v4 = vld [vmem:[#allocation6 + $0x828] sm:$0xff] }
 0x306   :  { %1072 = vmatmul.mubr.f32.vlgmr.msra.gmra.mrb[10].mxu0 %v881_v59  ;;  %1147 = vmatmul.mubr.f32.vlgmr.msra.gmra.mrb[10].mxu1 %v899_v13  ;;  %v894_v57 = vsel %vm99_vm0, %v892_v7, %v893_v11  ;;  %v914_v19 = vrot.slane %v882_v60, 4  ;;  %v910_v20 = vsel %vm117_vm1, %v908_v8, %v909_v12  ;;  %v916_v38 = vrot.slane %v3485_v2, 4  ;;  %v1365_v60 = vld [vmem:[#allocation6 + $0x910] sm:$0xff]  ;;  %v1320_v7 = vld [vmem:[#allocation6 + $0x7a8] sm:$0xff]  ;;  %v1367_v8 = vld [vmem:[#allocation6 + $0x920] sm:$0xff] }
 0x307   :  { %2956 = vmatpush3.bf16.msra.mxu0 %v3482_v3  ;;  %1076 = vmatprep.mubr.f32.mxu0 %v894_v57  ;;  %v902_v22 = vsel %vm108_vm2, %v900_v14, %v901_v15  ;;  %v994_v3 = vld [vmem:[#allocation6 + $0x740] sm:$0xff]  ;;  %v917_v39 = vrot.slane %v884_v6, 4  ;;  %v2991_v59 = vpack.c.bf16 %v1318_v58, %v1317_v56  ;;  %v3023_v1 = vpack.c.bf16 %v1350_v0, %v1349_v62  ;;  %v1368_v10 = vld [vmem:[#allocation6 + $0x928] sm:$0xff]  ;;  %v1337_v15 = vld [vmem:[#allocation6 + $0x830] sm:$0xff] }
 0x308   :  { %1151 = vmatprep.mubr.f32.mxu1 %v910_v20  ;;  %2958 = vmatprep.subr.bf16.mxu0 %v2957_v61  ;;  %v915_v25 = vsel %vm126_vm3, %v913_v18, %v914_v19  ;;  %v2969_v28 = vpack.c.bf16 %v995_v27, %v994_v3  ;;  %v1319_v6 = vld [vmem:[#allocation6 + $0x7a0] sm:$0xff]  ;;  %v1352_v12 = vld [vmem:[#allocation6 + $0x8a8] sm:$0xff]  ;;  %v3025_v13 = vpack.c.bf16 %v1368_v10, %v1367_v8  ;;  %v1321_v57 = vld [vmem:[#allocation6 + $0x7b0] sm:$0xff] }
 0x309   :  { %v918_v40 = vsel %vm126_vm3, %v916_v38, %v917_v39  ;;  %2988 = vmatpush3.bf16.msra.mxu1 %v2987_v47  ;;  %v2995_v9 = vpack.c.bf16 %v1320_v7, %v1319_v6  ;;  %v1351_v11 = vld [vmem:[#allocation6 + $0x8a0] sm:$0xff]  ;;  %v2997_v17 = vpack.c.bf16 %v1338_v16, %v1337_v15  ;;  %v1322_v18 = vld [vmem:[#allocation6 + $0x7b8] sm:$0xff]  ;;  %v1369_v19 = vld [vmem:[#allocation6 + $0x930] sm:$0xff]  ;;  %v3037_v47 = vpack.c.bf16 %v1374_v44, %v1373_v42 }
 0x30a   :  { %1077 = vmatmul.mubr.f32.gmra.mrb[12].mxu0 %v3485_v2  ;;  %1152 = vmatmul.mubr.f32.gmra.mrb[12].mxu1 %v902_v22  ;;  %v1335_v2 = vld [vmem:[#allocation6 + $0x820] sm:$0xff]  ;;  %v3027_v14 = vpack.c.bf16 %v1352_v12, %v1351_v11  ;;  %v2999_v20 = vpack.c.bf16 %v1322_v18, %v1321_v57  ;;  %v1353_v22 = vld [vmem:[#allocation6 + $0x8b0] sm:$0xff]  ;;  %v1340_v3 = vld [vmem:[#allocation6 + $0x848] sm:$0xff] }
 0x30b   :  { %2960 = vmatpush3.bf16.msra.mxu0 %v2957_v61  ;;  %2624 = vmatprep.mubr.f32.mxu0 %v915_v25  ;;  %v1366_v61 = vld [vmem:[#allocation6 + $0x918] sm:$0xff]  ;;  %v2993_v5 = vpack.c.bf16 %v1336_v4, %v1335_v2  ;;  %v3031_v25 = vpack.c.bf16 %v1354_v23, %v1353_v22  ;;  %v1329_v0 = vld [vmem:[#allocation6 + $0x7f0] sm:$0xff]  ;;  %v1379_v11 = vld [vmem:[#allocation6 + $0x980] sm:$0xff] }
 0x30c   :  { %2962 = vmatprep.subr.bf16.mxu0 %v2961_v21  ;;  %2990 = vmatprep.subr.bf16.mxu1 %v2989_v55  ;;  %v3021_v63 = vpack.c.bf16 %v1366_v61, %v1365_v60  ;;  %v1342_v38 = vld [vmem:[#allocation6 + $0x858] sm:$0xff]  ;;  %v1376_v55 = vld [vmem:[#allocation6 + $0x968] sm:$0xff]  ;;  %v1345_v61 = vld [vmem:[#allocation6 + $0x870] sm:$0xff] }
 0x30d   :  { %2992 = vmatpush3.bf16.msra.mxu1 %v2991_v59  ;;  %v3041_v58 = vpack.c.bf16 %v1376_v55, %v1375_v54  ;;  %v1359_v59 = vld [vmem:[#allocation6 + $0x8e0] sm:$0xff]  ;;  %v1360_v60 = vld [vmem:[#allocation6 + $0x8e8] sm:$0xff]  ;;  %v1377_v4 = vld [vmem:[#allocation6 + $0x970] sm:$0xff] }
 0x30e   :  { %2994 = vmatprep.subr.bf16.mxu1 %v2993_v5  ;;  %v3043_v62 = vpack.c.bf16 %v1360_v60, %v1359_v59  ;;  %v1378_v5 = vld [vmem:[#allocation6 + $0x978] sm:$0xff]  ;;  %v1361_v6 = vld [vmem:[#allocation6 + $0x8f0] sm:$0xff]  ;;  %v1380_v12 = vld [vmem:[#allocation6 + $0x988] sm:$0xff] }
 0x30f   :  { %2964 = vmatpush3.bf16.msra.mxu0 %v2961_v21  ;;  %v1370_v21 = vld [vmem:[#allocation6 + $0x938] sm:$0xff]  ;;  %v3045_v8 = vpack.c.bf16 %v1378_v5, %v1377_v4  ;;  %v2045_v16 = vld [vmem:[#allocation8 + $0x2] ss:$0 sm:$0xff]  ;;  %v2046_v55 = vld [vmem:[#allocation9 + $0x2] ss:$0 sm:$0xff] }
 0x310   :  { %2966 = vmatprep.subr.bf16.mxu0 %v2965_v26  ;;  %v3029_v24 = vpack.c.bf16 %v1370_v21, %v1369_v19  ;;  %v2047_v59 = vld [vmem:[#allocation11 + $0x2] ss:$0 sm:$0xff]  ;;  %v1382_v4 = vld [vmem:[#allocation6 + $0x998] sm:$0xff] }
 0x311   :  { %2996 = vmatpush3.bf16.msra.mxu1 %v2995_v9  ;;  %v1362_v9 = vld [vmem:[#allocation6 + $0x8f8] sm:$0xff] }
 0x312   :  { %2998 = vmatprep.subr.bf16.mxu1 %v2997_v17  ;;  %v3047_v10 = vpack.c.bf16 %v1362_v9, %v1361_v6 }
 0x313   :  { %2968 = vmatpush3.bf16.msra.mxu0 %v2965_v26  ;;  %v1339_v26 = vld [vmem:[#allocation6 + $0x840] sm:$0xff] }
 0x314   :  { %2970 = vmatprep.subr.bf16.mxu0 %v2969_v28  ;;  %v3001_v27 = vpack.c.bf16 %v1340_v3, %v1339_v26 }
 0x315   :  { %3000 = vmatpush3.bf16.msra.mxu1 %v2999_v20 }
 0x316   :  { %3002 = vmatprep.subr.bf16.mxu1 %v3001_v27 }
 0x317   :  { %2972 = vmatpush3.bf16.msra.mxu0 %v2969_v28  ;;  %v1323_v28 = vld [vmem:[#allocation6 + $0x7c0] sm:$0xff] }
 0x318   :  { %2974 = vmatprep.subr.bf16.mxu0 %v2973_v31 }
 0x31b   :  { %2976 = vmatpush3.bf16.msra.mxu0 %v2973_v31  ;;  %v3003_v31 = vpack.c.bf16 %v1324_v29, %v1323_v28 }
 0x31c   :  { %2978 = vmatprep.subr.bf16.mxu0 %v2977_v34 }
 0x31d   :  { %3004 = vmatpush3.bf16.msra.mxu1 %v3003_v31 }
 0x31f   :  { %2980 = vmatpush3.bf16.msra.mxu0 %v2977_v34  ;;  %v1356_v34 = vld [vmem:[#allocation6 + $0x8c8] sm:$0xff] }
 0x320   :  { %2982 = vmatprep.subr.bf16.mxu0 %v2981_v37  ;;  %v3035_v36 = vpack.c.bf16 %v1356_v34, %v1355_v33 }
 0x323   :  { %2984 = vmatpush3.bf16.msra.mxu0 %v2981_v37  ;;  %v1341_v37 = vld [vmem:[#allocation6 + $0x850] sm:$0xff] }
 0x324   :  { %3018 = vmatprep.subr.bf16.mxu0 %v3017_v51  ;;  %v3005_v39 = vpack.c.bf16 %v1342_v38, %v1341_v37  ;;  %v1327_v51 = vld [vmem:[#allocation6 + $0x7e0] sm:$0xff] }
 0x325   :  { %v3011_v56 = vpack.c.bf16 %v1328_v53, %v1327_v51 }
 0x326   :  { %2625 = vmatmul.mubr.f32.vlgmr.msra.gmra.mrb[14].mxu0 %v918_v40  ;;  %v1325_v40 = vld [vmem:[#allocation6 + $0x7d0] sm:$0xff]  ;;  %3006 = vmatprep.subr.bf16.mxu1 %v3005_v39 }
 0x327   :  { %3020 = vmatpush3.bf16.msra.mxu0 %v3019_v52  ;;  %v3007_v43 = vpack.c.bf16 %v1326_v41, %v1325_v40  ;;  %v3009_v52 = vpack.c.bf16 %v1344_v50, %v1343_v49 }
 0x328   :  { %3022 = vmatprep.subr.bf16.mxu0 %v3021_v63  ;;  %v1346_v63 = vld [vmem:[#allocation6 + $0x878] sm:$0xff] }
 0x329   :  { %3008 = vmatpush3.bf16.msra.mxu1 %v3007_v43  ;;  %v3013_v2 = vpack.c.bf16 %v1346_v63, %v1345_v61 }
 0x32a   :  { %3010 = vmatprep.subr.bf16.mxu1 %v3009_v52 }
 0x32b   :  { %3024 = vmatpush3.bf16.msra.mxu0 %v3023_v1  ;;  %v1330_v1 = vld [vmem:[#allocation6 + $0x7f8] sm:$0xff] }
 0x32c   :  { %3026 = vmatprep.subr.bf16.mxu0 %v3025_v13  ;;  %v3015_v7 = vpack.c.bf16 %v1330_v1, %v1329_v0  ;;  %v3501_v13 = vpack.c.bf16 %v1380_v12, %v1379_v11 }
 0x32d   :  { %3012 = vmatpush3.bf16.msra.mxu1 %v3011_v56 }
 0x32e   :  { %3014 = vmatprep.subr.bf16.mxu1 %v3013_v2  ;;  %v1381_v2 = vld [vmem:[#allocation6 + $0x990] sm:$0xff] }
 0x32f   :  { %3028 = vmatpush3.bf16.msra.mxu0 %v3027_v14 }
 0x330   :  { %3030 = vmatprep.subr.bf16.mxu0 %v3029_v24 }
 0x331   :  { %3016 = vmatpush3.bf16.msra.mxu1 %v3015_v7  ;;  %v3053_v7 = vpack.c.bf16 %v1382_v4, %v1381_v2  ;;  %v1710_v2 = vld [vmem:[#allocation6 + $0xa10] sm:$0xff]  ;;  %v1711_v4 = vld [vmem:[#allocation6 + $0xa18] sm:$0xff] }
 0x332   :  { %3050 = vmatprep.subr.bf16.mxu1 %v3501_v13 }
 0x333   :  { %3032 = vmatpush3.bf16.msra.mxu0 %v3031_v25 }
 0x334   :  { %3034 = vmatprep.subr.bf16.mxu0 %v3033_v35 }
 0x337   :  { %3036 = vmatpush3.bf16.msra.mxu0 %v3035_v36 }
 0x338   :  { %3038 = vmatprep.subr.bf16.mxu0 %v3037_v47 }
 0x33b   :  { %3040 = vmatpush3.bf16.msra.mxu0 %v3039_v48 }
 0x33c   :  { %3042 = vmatprep.subr.bf16.mxu0 %v3041_v58 }
 0x33f   :  { %3044 = vmatpush3.bf16.msra.mxu0 %v3043_v62 }
 0x340   :  { %3046 = vmatprep.subr.bf16.mxu0 %v3045_v8 }
 0x343   :  { %3048 = vmatpush3.bf16.msra.mxu0 %v3047_v10 }
 0x3d9   :  { %v2272_v14 = vpop.f32.mrb[10].mxu0  ;;  %v2310_v15 = vpop.f32.mrb[10].mxu1 }
 0x3da   :  { %v2273_v17 = vpop.f32.mrb[11].mxu0  ;;  %v2311_v57 = vpop.f32.mrb[11].mxu1 }
 0x3db   :  { %v2274_v18 = vadd.f32 %v2273_v17, %v2272_v14  ;;  %v2312_v19 = vadd.f32 %v2311_v57, %v2310_v15 }
 0x3dd   :  { %v1074_v20 = vadd.f32 %v2274_v18, %v2045_v16  ;;  %v2275_v21 = vpop.f32.mrb[12].mxu0  ;;  %v2313_v22 = vpop.f32.mrb[12].mxu1 }
 0x3de   :  { %v2276_v23 = vpop.f32.mrb[13].mxu0  ;;  %v2314_v24 = vpop.f32.mrb[13].mxu1 }
 0x3df   :  { %v2277_v25 = vadd.f32 %v2276_v23, %v2275_v21  ;;  %v2315_v26 = vadd.f32 %v2314_v24, %v2313_v22  ;;  %v1149_v3 = vadd.f32 %v2312_v19, %v1074_v20 }
 0x3e1   :  { %v1079_v27 = vadd.f32 %v2277_v25, %v2045_v16  ;;  %v1383_v25 = vld [vmem:[#allocation6 + $0x9a0] sm:$0xff] }
 0x3e3   :  { %v1154_v28 = vadd.f32 %v2315_v26, %v1079_v27  ;;  %v1384_v26 = vld [vmem:[#allocation6 + $0x9a8] sm:$0xff] }
 0x3f9   :  { %v2626_v29 = vpop.f32.mrb[14].mxu0 }
 0x3fa   :  { %v1229_v30 = vadd.f32 %v2626_v29, %v1154_v28  ;;  %v1223_v31 = vpop.f32.mrb[15].mxu0 }
 0x3fb   :  { %v1224_v32 = vadd.f32 %v1223_v31, %v1149_v3 }
 0x3fd   :  { %v1232_v33 = vadd.f32 %v1229_v30, %v1224_v32 }
 0x3ff   :  { %v1233_v34 = vrot.slane %v1232_v33, 4 }
 0x401   :  { %v1234_v35 = vadd.f32 %v1233_v34, %v1232_v33  ;;  %v1386_v33 = vld [vmem:[#allocation6 + $0x9b8] sm:$0xff] }
 0x403   :  { %v1235_v36 = vrot.slane %v1234_v35, 2 }
 0x405   :  { %v1236_v37 = vadd.f32 %v1235_v36, %v1234_v35  ;;  %v1388_v36 = vld [vmem:[#allocation6 + $0x9c8] sm:$0xff] }
 0x407   :  { %v1237_v38 = vrot.slane %v1236_v37, 1 }
 0x409   :  { %v1238_v39 = vadd.f32 %v1237_v38, %v1236_v37  ;;  %v1389_v38 = vld [vmem:[#allocation6 + $0x9d0] sm:$0xff] }
 0x40b   :  { %v1239_v40 = vmul.f32 0.0625, %v1238_v39  ;;  %v1390_v39 = vld [vmem:[#allocation6 + $0x9d8] sm:$0xff] }
 0x40d   :  { %v1240_v41 = vsub.f32 %v1224_v32, %v1239_v40  ;;  %v1241_v42 = vsub.f32 %v1229_v30, %v1239_v40  ;;  %v3057_v30 = vpack.c.bf16 %v1384_v26, %v1383_v25  ;;  %v1385_v32 = vld [vmem:[#allocation6 + $0x9b0] sm:$0xff]  ;;  %v3069_v40 = vpack.c.bf16 %v1390_v39, %v1389_v38  ;;  %v1731_v25 = vld [vmem:[#allocation6 + $0xab8] sm:$0xff]  ;;  %v1717_v38 = vld [vmem:[#allocation6 + $0xa48] sm:$0xff] }
 0x40e   :  { %v3061_v35 = vpack.c.bf16 %v1386_v33, %v1385_v32  ;;  %v1747_v32 = vld [vmem:[#allocation6 + $0xb38] sm:$0xff]  ;;  %v1764_v39 = vld [vmem:[#allocation6 + $0xbc0] sm:$0xff] }
 0x40f   :  { %v1242_v43 = vmul.f32 %v1240_v41, %v1240_v41  ;;  %v1243_v44 = vmul.f32 %v1241_v42, %v1241_v42 }
 0x411   :  { %v1244_v45 = vadd.f32 %v1243_v44, %v1242_v43  ;;  %v1393_v44 = vld [vmem:[#allocation6 + $0x9f0] sm:$0xff] }
 0x413   :  { %v1245_v46 = vrot.slane %v1244_v45, 4 }
 0x415   :  { %v1246_v47 = vadd.f32 %v1245_v46, %v1244_v45  ;;  %v1394_v45 = vld [vmem:[#allocation6 + $0x9f8] sm:$0xff] }
 0x416   :  { %v3077_v46 = vpack.c.bf16 %v1394_v45, %v1393_v44 }
 0x417   :  { %v1247_v48 = vrot.slane %v1246_v47, 2 }
 0x419   :  { %v1248_v49 = vadd.f32 %v1247_v48, %v1246_v47 }
 0x41b   :  { %v1249_v50 = vrot.slane %v1248_v49, 1 }
 0x41d   :  { %v1250_v51 = vadd.f32 %v1249_v50, %v1248_v49  ;;  %v1724_v50 = vld [vmem:[#allocation6 + $0xa80] sm:$0xff] }
 0x41f   :  { %v1251_v52 = vmul.f32 0.0625, %v1250_v51  ;;  %v1725_v51 = vld [vmem:[#allocation6 + $0xa88] sm:$0xff] }
 0x421   :  { %v1252_v53 = vadd.f32 1e-05, %v1251_v52  ;;  %v3081_v52 = vpack.c.bf16 %v1725_v51, %v1724_v50  ;;  %v1719_v50 = vld [vmem:[#allocation6 + $0xa58] sm:$0xff]  ;;  %v1766_v51 = vld [vmem:[#allocation6 + $0xbd0] sm:$0xff] }
 0x423   :  { %3198 = vrsqrt.f32 %v1252_v53  ;;  %v1708_v53 = vld [vmem:[#allocation6 + $0xa00] sm:$0xff]  ;;  %3082 = vmatprep.subr.bf16.mxu0 %v3081_v52 }
 0x42d   :  { %v3199_v54 = vpop.eup %3198 }
 0x42e   :  { %v1254_v56 = vmul.f32 %v3199_v54, %v1240_v41  ;;  %v1255_v58 = vmul.f32 %v3199_v54, %v1241_v42  ;;  %v1391_v41 = vld [vmem:[#allocation6 + $0x9e0] sm:$0xff]  ;;  %v1392_v42 = vld [vmem:[#allocation6 + $0x9e8] sm:$0xff] }
 0x42f   :  { %v3073_v43 = vpack.c.bf16 %v1392_v42, %v1391_v41  ;;  %v1709_v54 = vld [vmem:[#allocation6 + $0xa08] sm:$0xff]  ;;  %v1748_v42 = vld [vmem:[#allocation6 + $0xb40] sm:$0xff] }
 0x430   :  { %v1261_v60 = vmul.f32 %v2046_v55, %v1254_v56  ;;  %v1262_v61 = vmul.f32 %v2046_v55, %v1255_v58  ;;  %v1756_v55 = vld [vmem:[#allocation6 + $0xb80] sm:$0xff]  ;;  %v3083_v56 = vpack.c.bf16 %v1709_v54, %v1708_v53  ;;  %v1757_v58 = vld [vmem:[#allocation6 + $0xb88] sm:$0xff]  ;;  %v1767_v53 = vld [vmem:[#allocation6 + $0xbd8] sm:$0xff] }
 0x431   :  { %v1765_v41 = vld [vmem:[#allocation6 + $0xbc8] sm:$0xff]  ;;  %v1750_v54 = vld [vmem:[#allocation6 + $0xb50] sm:$0xff] }
 0x432   :  { %v1268_v62 = vadd.f32 %v2047_v59, %v1261_v60  ;;  %v1269_v63 = vadd.f32 %v2047_v59, %v1262_v61  ;;  %v1740_v59 = vld [vmem:[#allocation6 + $0xb00] sm:$0xff]  ;;  %v1741_v60 = vld [vmem:[#allocation6 + $0xb08] sm:$0xff]  ;;  %v3113_v61 = vpack.c.bf16 %v1757_v58, %v1756_v55  ;;  %v3129_v44 = vpack.c.bf16 %v1765_v41, %v1764_v39  ;;  %v1751_v55 = vld [vmem:[#allocation6 + $0xb58] sm:$0xff] }
 0x433   :  { %v3135_v58 = vpack.c.bf16 %v1751_v55, %v1750_v54 }
 0x434   :  { %3200 = vtanh.f32 %v1268_v62  ;;  %v3115_v62 = vpack.c.bf16 %v1741_v60, %v1740_v59  ;;  %v1736_v59 = vld [vmem:[#allocation6 + $0xae0] sm:$0xff]  ;;  %v1737_v60 = vld [vmem:[#allocation6 + $0xae8] sm:$0xff] }
 0x435   :  { %3202 = vtanh.f32 %v1269_v63  ;;  %v1726_v63 = vld [vmem:[#allocation6 + $0xa90] sm:$0xff] }
 0x43e   :  { %v3201_v0 = vpop.eup %3200 }
 0x43f   :  { %v3203_v1 = vpop.eup %3202  ;;  %1272 = vst [vmem:[#allocation2 + $0x2] sm:$0xff] %v3201_v0  ;;  %v1727_v0 = vld [vmem:[#allocation6 + $0xa98] sm:$0xff] }
 0x440   :  { %1273 = vst [vmem:[#allocation2 + $0x12] sm:$0xff] %v3203_v1  ;;  %v3085_v1 = vpack.c.bf16 %v1727_v0, %v1726_v63  ;;  %v1721_v63 = vld [vmem:[#allocation6 + $0xa68] sm:$0xff]  ;;  %v1768_v0 = vld [vmem:[#allocation6 + $0xbe0] sm:$0xff] }
 0x446   :  { %v1274_v5 = vld [vmem:[#allocation2] sm:$0xff]  ;;  %v1275_v6 = vld [vmem:[#allocation2 + $0x8] sm:$0xf] }
 0x447   :  { %v1282_v8 = vrot.slane %v1274_v5, 1  ;;  %v1283_v9 = vrot.slane %v1275_v6, 1  ;;  %v1298_v10 = vrot.slane %v1274_v5, 3  ;;  %v1299_v11 = vrot.slane %v1275_v6, 3  ;;  %v3504_v12 = vld [vmem:[#allocation2 + $0x10] sm:$0xff] }
 0x448   :  { %v1290_v14 = vrot.slane %v1274_v5, 2  ;;  %v1291_v15 = vrot.slane %v1275_v6, 2  ;;  %v1277_v16 = vld [vmem:[#allocation2 + $0x18] sm:$0xf]  ;;  %v1285_v17 = vrot.slane %v3504_v12, 1  ;;  %v1301_v57 = vrot.slane %v3504_v12, 3 }
 0x449   :  { %v1284_v18 = vsel %vm99_vm0, %v1282_v8, %v1283_v9  ;;  %v1300_v19 = vsel %vm117_vm1, %v1298_v10, %v1299_v11  ;;  %v1286_v20 = vrot.slane %v1277_v16, 1  ;;  %v1302_v21 = vrot.slane %v1277_v16, 3  ;;  %v1742_v8 = vld [vmem:[#allocation6 + $0xb10] sm:$0xff]  ;;  %v1743_v10 = vld [vmem:[#allocation6 + $0xb18] sm:$0xff] }
 0x44a   :  { %1464 = vmatprep.mubr.f32.mxu1 %v1284_v18  ;;  %1539 = vmatprep.mubr.f32.mxu0 %v1300_v19  ;;  %v1292_v22 = vsel %vm108_vm2, %v1290_v14, %v1291_v15  ;;  %v1293_v23 = vrot.slane %v3504_v12, 2  ;;  %v1294_v24 = vrot.slane %v1277_v16, 2  ;;  %v1306_v27 = vrot.slane %v1274_v5, 4  ;;  %v1729_v14 = vld [vmem:[#allocation6 + $0xaa8] sm:$0xff] }
 0x44b   :  { %1465 = vmatmul.mubr.f32.vlgmr.msra.gmra.mrb[14].mxu1 %v1274_v5  ;;  %1540 = vmatmul.mubr.f32.vlgmr.msra.gmra.mrb[16].mxu0 %v1292_v22  ;;  %v1287_v3 = vsel %vm99_vm0, %v1285_v17, %v1286_v20  ;;  %v1307_v28 = vrot.slane %v1275_v6, 4  ;;  %v1303_v29 = vsel %vm117_vm1, %v1301_v57, %v1302_v21  ;;  %v1309_v47 = vrot.slane %v3504_v12, 4  ;;  %v1758_v6 = vld [vmem:[#allocation6 + $0xb90] sm:$0xff]  ;;  %v1713_v17 = vld [vmem:[#allocation6 + $0xa28] sm:$0xff]  ;;  %v1760_v57 = vld [vmem:[#allocation6 + $0xba0] sm:$0xff] }
 0x44c   :  { %3052 = vmatpush3.bf16.msra.mxu1 %v3501_v13  ;;  %1469 = vmatprep.mubr.f32.mxu1 %v1287_v3  ;;  %v1295_v31 = vsel %vm108_vm2, %v1293_v23, %v1294_v24  ;;  %v1387_v13 = vld [vmem:[#allocation6 + $0x9c0] sm:$0xff]  ;;  %v1310_v48 = vrot.slane %v1277_v16, 4  ;;  %v3087_v5 = vpack.c.bf16 %v1711_v4, %v1710_v2  ;;  %v3119_v11 = vpack.c.bf16 %v1743_v10, %v1742_v8  ;;  %v1761_v19 = vld [vmem:[#allocation6 + $0xba8] sm:$0xff]  ;;  %v1730_v24 = vld [vmem:[#allocation6 + $0xab0] sm:$0xff] }
 0x44d   :  { %1544 = vmatprep.mubr.f32.mxu0 %v1303_v29  ;;  %3054 = vmatprep.subr.bf16.mxu1 %v3053_v7  ;;  %v1308_v34 = vsel %vm126_vm3, %v1306_v27, %v1307_v28  ;;  %v3065_v37 = vpack.c.bf16 %v1388_v36, %v1387_v13  ;;  %v1712_v16 = vld [vmem:[#allocation6 + $0xa20] sm:$0xff]  ;;  %v1745_v21 = vld [vmem:[#allocation6 + $0xb28] sm:$0xff]  ;;  %v3121_v22 = vpack.c.bf16 %v1761_v19, %v1760_v57  ;;  %v1714_v3 = vld [vmem:[#allocation6 + $0xa30] sm:$0xff] }
 0x44e   :  { %v1311_v49 = vsel %vm126_vm3, %v1309_v47, %v1310_v48  ;;  %3084 = vmatpush3.bf16.msra.mxu0 %v3083_v56  ;;  %v3091_v18 = vpack.c.bf16 %v1713_v17, %v1712_v16  ;;  %v1744_v20 = vld [vmem:[#allocation6 + $0xb20] sm:$0xff]  ;;  %v3093_v26 = vpack.c.bf16 %v1731_v25, %v1730_v24  ;;  %v1715_v27 = vld [vmem:[#allocation6 + $0xa38] sm:$0xff]  ;;  %v1762_v28 = vld [vmem:[#allocation6 + $0xbb0] sm:$0xff]  ;;  %v3133_v56 = vpack.c.bf16 %v1767_v53, %v1766_v51 }
 0x44f   :  { %1470 = vmatmul.mubr.f32.gmra.mrb[16].mxu1 %v3504_v12  ;;  %1545 = vmatmul.mubr.f32.gmra.mrb[18].mxu0 %v1295_v31  ;;  %v1728_v12 = vld [vmem:[#allocation6 + $0xaa0] sm:$0xff]  ;;  %v3123_v23 = vpack.c.bf16 %v1745_v21, %v1744_v20  ;;  %v3095_v29 = vpack.c.bf16 %v1715_v27, %v1714_v3  ;;  %v1746_v31 = vld [vmem:[#allocation6 + $0xb30] sm:$0xff]  ;;  %v1733_v13 = vld [vmem:[#allocation6 + $0xac8] sm:$0xff] }
 0x450   :  { %3056 = vmatpush3.bf16.msra.mxu1 %v3053_v7  ;;  %2659 = vmatprep.mubr.f32.mxu1 %v1308_v34  ;;  %v1759_v7 = vld [vmem:[#allocation6 + $0xb98] sm:$0xff]  ;;  %v3089_v15 = vpack.c.bf16 %v1729_v14, %v1728_v12  ;;  %v3127_v34 = vpack.c.bf16 %v1747_v32, %v1746_v31  ;;  %v1722_v10 = vld [vmem:[#allocation6 + $0xa70] sm:$0xff]  ;;  %v1772_v20 = vld [vmem:[#allocation6 + $0xc00] sm:$0xff] }
 0x451   :  { %3058 = vmatprep.subr.bf16.mxu1 %v3057_v30  ;;  %3086 = vmatprep.subr.bf16.mxu0 %v3085_v1  ;;  %v3117_v9 = vpack.c.bf16 %v1759_v7, %v1758_v6  ;;  %v1735_v47 = vld [vmem:[#allocation6 + $0xad8] sm:$0xff]  ;;  %v1769_v1 = vld [vmem:[#allocation6 + $0xbe8] sm:$0xff]  ;;  %v1738_v7 = vld [vmem:[#allocation6 + $0xaf0] sm:$0xff] }
 0x452   :  { %3088 = vmatpush3.bf16.msra.mxu0 %v3087_v5  ;;  %v3137_v4 = vpack.c.bf16 %v1769_v1, %v1768_v0  ;;  %v1752_v5 = vld [vmem:[#allocation6 + $0xb60] sm:$0xff]  ;;  %v1753_v6 = vld [vmem:[#allocation6 + $0xb68] sm:$0xff]  ;;  %v1770_v14 = vld [vmem:[#allocation6 + $0xbf0] sm:$0xff] }
 0x453   :  { %3090 = vmatprep.subr.bf16.mxu0 %v3089_v15  ;;  %v3139_v8 = vpack.c.bf16 %v1753_v6, %v1752_v5  ;;  %v1771_v15 = vld [vmem:[#allocation6 + $0xbf8] sm:$0xff]  ;;  %v1754_v16 = vld [vmem:[#allocation6 + $0xb70] sm:$0xff]  ;;  %v1773_v21 = vld [vmem:[#allocation6 + $0xc08] sm:$0xff] }
 0x454   :  { %3060 = vmatpush3.bf16.msra.mxu1 %v3057_v30  ;;  %v1763_v30 = vld [vmem:[#allocation6 + $0xbb8] sm:$0xff]  ;;  %v3141_v57 = vpack.c.bf16 %v1771_v15, %v1770_v14  ;;  %v2048_v25 = vld [vmem:[#allocation8 + $0x3] ss:$0 sm:$0xff]  ;;  %v2049_v1 = vld [vmem:[#allocation9 + $0x3] ss:$0 sm:$0xff] }
 0x455   :  { %3062 = vmatprep.subr.bf16.mxu1 %v3061_v35  ;;  %v3125_v33 = vpack.c.bf16 %v1763_v30, %v1762_v28  ;;  %v2050_v5 = vld [vmem:[#allocation11 + $0x3] ss:$0 sm:$0xff]  ;;  %v1775_v14 = vld [vmem:[#allocation6 + $0xc18] sm:$0xff] }
 0x456   :  { %3092 = vmatpush3.bf16.msra.mxu0 %v3091_v18  ;;  %v1755_v18 = vld [vmem:[#allocation6 + $0xb78] sm:$0xff] }
 0x457   :  { %3094 = vmatprep.subr.bf16.mxu0 %v3093_v26  ;;  %v3143_v19 = vpack.c.bf16 %v1755_v18, %v1754_v16 }
 0x458   :  { %3064 = vmatpush3.bf16.msra.mxu1 %v3061_v35  ;;  %v1732_v35 = vld [vmem:[#allocation6 + $0xac0] sm:$0xff] }
 0x459   :  { %3066 = vmatprep.subr.bf16.mxu1 %v3065_v37  ;;  %v3097_v36 = vpack.c.bf16 %v1733_v13, %v1732_v35 }
 0x45a   :  { %3096 = vmatpush3.bf16.msra.mxu0 %v3095_v29 }
 0x45b   :  { %3098 = vmatprep.subr.bf16.mxu0 %v3097_v36 }
 0x45c   :  { %3068 = vmatpush3.bf16.msra.mxu1 %v3065_v37  ;;  %v1716_v37 = vld [vmem:[#allocation6 + $0xa40] sm:$0xff] }
 0x45d   :  { %3070 = vmatprep.subr.bf16.mxu1 %v3069_v40 }
 0x460   :  { %3072 = vmatpush3.bf16.msra.mxu1 %v3069_v40  ;;  %v3099_v40 = vpack.c.bf16 %v1717_v38, %v1716_v37 }
 0x461   :  { %3074 = vmatprep.subr.bf16.mxu1 %v3073_v43 }
 0x462   :  { %3100 = vmatpush3.bf16.msra.mxu0 %v3099_v40 }
 0x464   :  { %3076 = vmatpush3.bf16.msra.mxu1 %v3073_v43  ;;  %v1749_v43 = vld [vmem:[#allocation6 + $0xb48] sm:$0xff] }
 0x465   :  { %3078 = vmatprep.subr.bf16.mxu1 %v3077_v46  ;;  %v3131_v45 = vpack.c.bf16 %v1749_v43, %v1748_v42 }
 0x468   :  { %3080 = vmatpush3.bf16.msra.mxu1 %v3077_v46  ;;  %v1734_v46 = vld [vmem:[#allocation6 + $0xad0] sm:$0xff] }
 0x469   :  { %3114 = vmatprep.subr.bf16.mxu1 %v3113_v61  ;;  %v3101_v48 = vpack.c.bf16 %v1735_v47, %v1734_v46  ;;  %v1720_v61 = vld [vmem:[#allocation6 + $0xa60] sm:$0xff] }
 0x46a   :  { %v3107_v2 = vpack.c.bf16 %v1721_v63, %v1720_v61 }
 0x46b   :  { %2660 = vmatmul.mubr.f32.vlgmr.msra.gmra.mrb[18].mxu1 %v1311_v49  ;;  %v1718_v49 = vld [vmem:[#allocation6 + $0xa50] sm:$0xff]  ;;  %3102 = vmatprep.subr.bf16.mxu0 %v3101_v48 }
 0x46c   :  { %3116 = vmatpush3.bf16.msra.mxu1 %v3115_v62  ;;  %v3103_v52 = vpack.c.bf16 %v1719_v50, %v1718_v49  ;;  %v3105_v62 = vpack.c.bf16 %v1737_v60, %v1736_v59 }
 0x46d   :  { %3118 = vmatprep.subr.bf16.mxu1 %v3117_v9  ;;  %v1739_v9 = vld [vmem:[#allocation6 + $0xaf8] sm:$0xff] }
 0x46e   :  { %3104 = vmatpush3.bf16.msra.mxu0 %v3103_v52  ;;  %v3109_v12 = vpack.c.bf16 %v1739_v9, %v1738_v7 }
 0x46f   :  { %3106 = vmatprep.subr.bf16.mxu0 %v3105_v62 }
 0x470   :  { %3120 = vmatpush3.bf16.msra.mxu1 %v3119_v11  ;;  %v1723_v11 = vld [vmem:[#allocation6 + $0xa78] sm:$0xff] }
 0x471   :  { %3122 = vmatprep.subr.bf16.mxu1 %v3121_v22  ;;  %v3111_v17 = vpack.c.bf16 %v1723_v11, %v1722_v10  ;;  %v3520_v22 = vpack.c.bf16 %v1773_v21, %v1772_v20 }
 0x472   :  { %3108 = vmatpush3.bf16.msra.mxu0 %v3107_v2 }
 0x473   :  { %3110 = vmatprep.subr.bf16.mxu0 %v3109_v12  ;;  %v1774_v12 = vld [vmem:[#allocation6 + $0xc10] sm:$0xff] }
 0x474   :  { %3124 = vmatpush3.bf16.msra.mxu1 %v3123_v23 }
 0x475   :  { %3126 = vmatprep.subr.bf16.mxu1 %v3125_v33 }
 0x476   :  { %3112 = vmatpush3.bf16.msra.mxu0 %v3111_v17  ;;  %v3149_v17 = vpack.c.bf16 %v1775_v14, %v1774_v12 }
 0x477   :  { %3146 = vmatprep.subr.bf16.mxu0 %v3520_v22 }
 0x478   :  { %3128 = vmatpush3.bf16.msra.mxu1 %v3127_v34 }
 0x479   :  { %3130 = vmatprep.subr.bf16.mxu1 %v3129_v44 }
 0x47c   :  { %3132 = vmatpush3.bf16.msra.mxu1 %v3131_v45 }
 0x47d   :  { %3134 = vmatprep.subr.bf16.mxu1 %v3133_v56 }
 0x480   :  { %3136 = vmatpush3.bf16.msra.mxu1 %v3135_v58 }
 0x481   :  { %3138 = vmatprep.subr.bf16.mxu1 %v3137_v4 }
 0x484   :  { %3140 = vmatpush3.bf16.msra.mxu1 %v3139_v8 }
 0x485   :  { %3142 = vmatprep.subr.bf16.mxu1 %v3141_v57 }
 0x488   :  { %3144 = vmatpush3.bf16.msra.mxu1 %v3143_v19 }
 0x51e   :  { %v2366_v23 = vpop.f32.mrb[14].mxu1  ;;  %v2404_v24 = vpop.f32.mrb[16].mxu0 }
 0x51f   :  { %v2367_v26 = vpop.f32.mrb[15].mxu1  ;;  %v2405_v3 = vpop.f32.mrb[17].mxu0 }
 0x520   :  { %v2368_v27 = vadd.f32 %v2367_v26, %v2366_v23  ;;  %v2406_v28 = vadd.f32 %v2405_v3, %v2404_v24 }
 0x522   :  { %v1467_v29 = vadd.f32 %v2368_v27, %v2048_v25  ;;  %v2369_v30 = vpop.f32.mrb[16].mxu1  ;;  %v2407_v31 = vpop.f32.mrb[18].mxu0 }
 0x523   :  { %v2370_v32 = vpop.f32.mrb[17].mxu1  ;;  %v2408_v33 = vpop.f32.mrb[19].mxu0 }
 0x524   :  { %v2371_v34 = vadd.f32 %v2370_v32, %v2369_v30  ;;  %v2409_v35 = vadd.f32 %v2408_v33, %v2407_v31  ;;  %v1542_v13 = vadd.f32 %v2406_v28, %v1467_v29 }
 0x526   :  { %v1472_v36 = vadd.f32 %v2371_v34, %v2048_v25  ;;  %v1776_v34 = vld [vmem:[#allocation6 + $0xc20] sm:$0xff] }
 0x528   :  { %v1547_v37 = vadd.f32 %v2409_v35, %v1472_v36  ;;  %v1777_v35 = vld [vmem:[#allocation6 + $0xc28] sm:$0xff] }
 0x53e   :  { %v2661_v38 = vpop.f32.mrb[18].mxu1 }
 0x53f   :  { %v1622_v39 = vadd.f32 %v2661_v38, %v1547_v37  ;;  %v1616_v40 = vpop.f32.mrb[19].mxu1 }
 0x540   :  { %v1617_v41 = vadd.f32 %v1616_v40, %v1542_v13 }
 0x542   :  { %v1625_v42 = vadd.f32 %v1622_v39, %v1617_v41 }
 0x544   :  { %v1626_v43 = vrot.slane %v1625_v42, 4 }
 0x546   :  { %v1627_v44 = vadd.f32 %v1626_v43, %v1625_v42  ;;  %v1779_v42 = vld [vmem:[#allocation6 + $0xc38] sm:$0xff] }
 0x548   :  { %v1628_v45 = vrot.slane %v1627_v44, 2 }
 0x54a   :  { %v1629_v46 = vadd.f32 %v1628_v45, %v1627_v44  ;;  %v1781_v45 = vld [vmem:[#allocation6 + $0xc48] sm:$0xff] }
 0x54c   :  { %v1630_v47 = vrot.slane %v1629_v46, 1 }
 0x54e   :  { %v1631_v48 = vadd.f32 %v1630_v47, %v1629_v46  ;;  %v1782_v47 = vld [vmem:[#allocation6 + $0xc50] sm:$0xff] }
 0x550   :  { %v1632_v49 = vmul.f32 0.0625, %v1631_v48  ;;  %v1783_v48 = vld [vmem:[#allocation6 + $0xc58] sm:$0xff] }
 0x552   :  { %v1633_v50 = vsub.f32 %v1617_v41, %v1632_v49  ;;  %v1634_v51 = vsub.f32 %v1622_v39, %v1632_v49  ;;  %v3153_v39 = vpack.c.bf16 %v1777_v35, %v1776_v34  ;;  %v1778_v41 = vld [vmem:[#allocation6 + $0xc30] sm:$0xff]  ;;  %v3165_v49 = vpack.c.bf16 %v1783_v48, %v1782_v47 }
 0x553   :  { %v3157_v44 = vpack.c.bf16 %v1779_v42, %v1778_v41 }
 0x554   :  { %v1635_v52 = vmul.f32 %v1633_v50, %v1633_v50  ;;  %v1636_v53 = vmul.f32 %v1634_v51, %v1634_v51 }
 0x556   :  { %v1637_v54 = vadd.f32 %v1636_v53, %v1635_v52  ;;  %v1786_v53 = vld [vmem:[#allocation6 + $0xc70] sm:$0xff] }
 0x558   :  { %v1638_v55 = vrot.slane %v1637_v54, 4 }
 0x55a   :  { %v1639_v56 = vadd.f32 %v1638_v55, %v1637_v54  ;;  %v1787_v54 = vld [vmem:[#allocation6 + $0xc78] sm:$0xff] }
 0x55b   :  { %v3173_v55 = vpack.c.bf16 %v1787_v54, %v1786_v53 }
 0x55c   :  { %v1640_v58 = vrot.slane %v1639_v56, 2 }
 0x55e   :  { %v1641_v59 = vadd.f32 %v1640_v58, %v1639_v56 }
 0x560   :  { %v1642_v60 = vrot.slane %v1641_v59, 1 }
 0x562   :  { %v1643_v61 = vadd.f32 %v1642_v60, %v1641_v59 }
 0x564   :  { %v1644_v62 = vmul.f32 0.0625, %v1643_v61 }
 0x566   :  { %v1645_v63 = vadd.f32 1e-05, %v1644_v62  ;;  %v2051_v62 = vld [vmem:[#allocation8 + $0x4] ss:$0 sm:$0xff] }
 0x568   :  { %3204 = vrsqrt.f32 %v1645_v63 }
 0x572   :  { %v3205_v0 = vpop.eup %3204 }
 0x573   :  { %v1647_v2 = vmul.f32 %v3205_v0, %v1633_v50  ;;  %v1648_v4 = vmul.f32 %v3205_v0, %v1634_v51  ;;  %v1784_v50 = vld [vmem:[#allocation6 + $0xc60] sm:$0xff]  ;;  %v1785_v51 = vld [vmem:[#allocation6 + $0xc68] sm:$0xff] }
 0x574   :  { %v3169_v52 = vpack.c.bf16 %v1785_v51, %v1784_v50 }
 0x575   :  { %v1654_v6 = vmul.f32 %v2049_v1, %v1647_v2  ;;  %v1655_v7 = vmul.f32 %v2049_v1, %v1648_v4 }
 0x577   :  { %v1661_v8 = vadd.f32 %v2050_v5, %v1654_v6  ;;  %v1662_v9 = vadd.f32 %v2050_v5, %v1655_v7 }
 0x579   :  { %3206 = vtanh.f32 %v1661_v8 }
 0x57a   :  { %3208 = vtanh.f32 %v1662_v9 }
 0x583   :  { %v3207_v10 = vpop.eup %3206 }
 0x584   :  { %v3209_v11 = vpop.eup %3208  ;;  %1665 = vst [vmem:[#allocation2 + $0x2] sm:$0xff] %v3207_v10 }
 0x585   :  { %1666 = vst [vmem:[#allocation2 + $0x12] sm:$0xff] %v3209_v11 }
 0x58b   :  { %v1667_v15 = vld [vmem:[#allocation2] sm:$0xff]  ;;  %v1668_v16 = vld [vmem:[#allocation2 + $0x8] sm:$0xf] }
 0x58c   :  { %v1675_v57 = vrot.slane %v1667_v15, 1  ;;  %v1676_v18 = vrot.slane %v1668_v16, 1  ;;  %v1691_v19 = vrot.slane %v1667_v15, 3  ;;  %v1692_v20 = vrot.slane %v1668_v16, 3  ;;  %v3523_v21 = vld [vmem:[#allocation2 + $0x10] sm:$0xff] }
 0x58d   :  { %v1683_v23 = vrot.slane %v1667_v15, 2  ;;  %v1684_v24 = vrot.slane %v1668_v16, 2  ;;  %v1670_v25 = vld [vmem:[#allocation2 + $0x18] sm:$0xf]  ;;  %v1678_v26 = vrot.slane %v3523_v21, 1  ;;  %v1694_v3 = vrot.slane %v3523_v21, 3 }
 0x58e   :  { %v1677_v27 = vsel %vm99_vm0, %v1675_v57, %v1676_v18  ;;  %v1693_v28 = vsel %vm117_vm1, %v1691_v19, %v1692_v20  ;;  %v1679_v29 = vrot.slane %v1670_v25, 1  ;;  %v1695_v30 = vrot.slane %v1670_v25, 3 }
 0x58f   :  { %1857 = vmatprep.mubr.f32.mxu0 %v1677_v27  ;;  %1932 = vmatprep.mubr.f32.mxu1 %v1693_v28  ;;  %v1685_v31 = vsel %vm108_vm2, %v1683_v23, %v1684_v24  ;;  %v1686_v32 = vrot.slane %v3523_v21, 2  ;;  %v1687_v33 = vrot.slane %v1670_v25, 2  ;;  %v1699_v36 = vrot.slane %v1667_v15, 4 }
 0x590   :  { %1858 = vmatmul.mubr.f32.vlgmr.msra.gmra.mrb[20].mxu0 %v1667_v15  ;;  %1933 = vmatmul.mubr.f32.vlgmr.msra.gmra.mrb[20].mxu1 %v1685_v31  ;;  %v1680_v13 = vsel %vm99_vm0, %v1678_v26, %v1679_v29  ;;  %v1700_v37 = vrot.slane %v1668_v16, 4  ;;  %v1696_v38 = vsel %vm117_vm1, %v1694_v3, %v1695_v30  ;;  %v1702_v56 = vrot.slane %v3523_v21, 4 }
 0x591   :  { %3148 = vmatpush3.bf16.msra.mxu0 %v3520_v22  ;;  %1862 = vmatprep.mubr.f32.mxu0 %v1680_v13  ;;  %v1688_v40 = vsel %vm108_vm2, %v1686_v32, %v1687_v33  ;;  %v1780_v22 = vld [vmem:[#allocation6 + $0xc40] sm:$0xff]  ;;  %v1703_v58 = vrot.slane %v1670_v25, 4 }
 0x592   :  { %1937 = vmatprep.mubr.f32.mxu1 %v1696_v38  ;;  %3150 = vmatprep.subr.bf16.mxu0 %v3149_v17  ;;  %v1701_v43 = vsel %vm126_vm3, %v1699_v36, %v1700_v37  ;;  %v3161_v46 = vpack.c.bf16 %v1781_v45, %v1780_v22 }
 0x593   :  { %v1704_v59 = vsel %vm126_vm3, %v1702_v56, %v1703_v58 }
 0x594   :  { %1863 = vmatmul.mubr.f32.gmra.mrb[22].mxu0 %v3523_v21  ;;  %1938 = vmatmul.mubr.f32.gmra.mrb[22].mxu1 %v1688_v40 }
 0x595   :  { %3152 = vmatpush3.bf16.msra.mxu0 %v3149_v17  ;;  %2694 = vmatprep.mubr.f32.mxu0 %v1701_v43 }
 0x596   :  { %3154 = vmatprep.subr.bf16.mxu0 %v3153_v39 }
 0x599   :  { %3156 = vmatpush3.bf16.msra.mxu0 %v3153_v39 }
 0x59a   :  { %3158 = vmatprep.subr.bf16.mxu0 %v3157_v44 }
 0x59d   :  { %3160 = vmatpush3.bf16.msra.mxu0 %v3157_v44 }
 0x59e   :  { %3162 = vmatprep.subr.bf16.mxu0 %v3161_v46 }
 0x5a1   :  { %3164 = vmatpush3.bf16.msra.mxu0 %v3161_v46 }
 0x5a2   :  { %3166 = vmatprep.subr.bf16.mxu0 %v3165_v49 }
 0x5a5   :  { %3168 = vmatpush3.bf16.msra.mxu0 %v3165_v49 }
 0x5a6   :  { %3170 = vmatprep.subr.bf16.mxu0 %v3169_v52 }
 0x5a9   :  { %3172 = vmatpush3.bf16.msra.mxu0 %v3169_v52 }
 0x5aa   :  { %3174 = vmatprep.subr.bf16.mxu0 %v3173_v55 }
 0x5ad   :  { %3176 = vmatpush3.bf16.msra.mxu0 %v3173_v55 }
 0x5b0   :  { %2695 = vmatmul.mubr.f32.vlgmr.msra.gmra.mrb[24].mxu0 %v1704_v59 }
 0x663   :  { %v2460_v60 = vpop.f32.mrb[20].mxu0  ;;  %v2498_v61 = vpop.f32.mrb[20].mxu1 }
 0x664   :  { %v2461_v63 = vpop.f32.mrb[21].mxu0  ;;  %v2499_v0 = vpop.f32.mrb[21].mxu1 }
 0x665   :  { %v2462_v1 = vadd.f32 %v2461_v63, %v2460_v60  ;;  %v2500_v2 = vadd.f32 %v2499_v0, %v2498_v61 }
 0x667   :  { %v1860_v4 = vadd.f32 %v2462_v1, %v2051_v62  ;;  %v2463_v5 = vpop.f32.mrb[22].mxu0  ;;  %v2501_v6 = vpop.f32.mrb[22].mxu1 }
 0x668   :  { %v2464_v7 = vpop.f32.mrb[23].mxu0  ;;  %v2502_v8 = vpop.f32.mrb[23].mxu1 }
 0x669   :  { %v2465_v9 = vadd.f32 %v2464_v7, %v2463_v5  ;;  %v2503_v10 = vadd.f32 %v2502_v8, %v2501_v6  ;;  %v1935_v11 = vadd.f32 %v2500_v2, %v1860_v4 }
 0x66b   :  { %v1865_v12 = vadd.f32 %v2465_v9, %v2051_v62 }
 0x66d   :  { %v1940_v14 = vadd.f32 %v2503_v10, %v1865_v12 }
 0x683   :  { %v2696_v15 = vpop.f32.mrb[24].mxu0 }
 0x684   :  { %v2015_v16 = vadd.f32 %v2696_v15, %v1940_v14  ;;  %v2009_v17 = vpop.f32.mrb[25].mxu0 }
 0x685   :  { %v2010_v57 = vadd.f32 %v2009_v17, %v1935_v11 }
 0x686   :  { %2019 = vst [vmem:[#allocation12 + $0x8] sm:$0xff] %v2015_v16 }
 0x687   :  { %2018 = vst [vmem:[#allocation12] sm:$0xff] %v2010_v57 }
 0x688   :  { %3331 = shalt.err (!%p3328_p2)
}
 0x689   :  { %s3332_s7 = scalar_lea.hbm %s3559_s5, 256 }
 0x68a   :  { %p3333_p3 = scmp.ne.s32.totalorder %s3559_s5, %s3332_s7  ;;  %p3336_p4 = scmp.lt.u32.totalorder %s3332_s7, %s3559_s5 }
 0x68c   :  { %p3338_p5 = pnand %p3336_p4, %p3333_p3 }
 0x68e   :  { %3341 = shalt.err (!%p3338_p5)
}
 0x68f   :  { %2031 = dma.vmem_to_hbm [thread:$0]  %s2026_s28, 256, %s3559_s5, [#allocation5], %s3352_s30, %s3352_s30, %s3353_s6  }
 0x690   :  { %3348 = dma.done.wait [#allocation5], 256  }
 0x691   :  { %3349 = vsyncadd [#allocation5], 4294967040 }
 0x692   :  { %2035 = vsyncpa [#allocation4], 1 }
 0x693   :  { %2036 = vsyncpa [#allocation7], 1 }
 0x694   :  { %2037 = vsyncpa [#allocation10], 1 }
 0x695   :  { %2038 = vsyncpa [#allocation5], 1 }

</bundles_post_ra>
